<compile_context>
chip_gen: v5e
topology: v5e:2x2
jax: 0.10.0
libtpu: 0.0.40
codegen_flags: <defaults>
</compile_context>

<pallas_src>
import math

import jax
import jax.numpy as jnp
from jax.experimental import pallas as pl
from jax.experimental.pallas import tpu as pltpu  # noqa: F401  (TPU backend)

# ---- model hyperparameters (small, consistent with the module) ----
S = 8            # sequence length (e.g. flattened H*W)
B = 2            # batch
D = 32           # d_model
NHEAD = 4
HEAD_DIM = D // NHEAD
FF = 64          # dim_feedforward
NUM_LAYERS = 2
LN_EPS = 1e-5
N = B * S        # flattened tokens


def _layernorm(x, gamma, beta):
    mean = jnp.mean(x, axis=-1, keepdims=True)
    xc = x - mean
    var = jnp.mean(xc * xc, axis=-1, keepdims=True)
    return xc * jax.lax.rsqrt(var + LN_EPS) * gamma + beta


def encoder_kernel(x_ref, pos_ref,
                   wqk_ref, bqk_ref, wv_ref, bv_ref, wo_ref, bo_ref,
                   g1_ref, be1_ref, w1_ref, bf1_ref, w2_ref, bf2_ref,
                   g2_ref, be2_ref,
                   o_ref):
    x = x_ref[...]        # (N, D) f32, N = B*S
    pos = pos_ref[...]    # (N, D)
    scale = 1.0 / math.sqrt(HEAD_DIM)

    for l in range(NUM_LAYERS):      # static unroll: all layers fused in one call
        qk_in = x + pos

        # fused Q/K projection (host pre-transposed): (N, D) @ (D, 2D)
        qk = jnp.dot(qk_in, wqk_ref[l], preferred_element_type=jnp.float32) + bqk_ref[l]
        q = qk[:, :D]
        k = qk[:, D:]
        v = jnp.dot(x, wv_ref[l], preferred_element_type=jnp.float32) + bv_ref[l]

        # (B, S, D) views: split of the leading token axis only (sublane-tile aligned)
        q3 = q.reshape(B, S, D)
        k3 = k.reshape(B, S, D)
        v3 = v.reshape(B, S, D)

        wo_l = wo_ref[l]             # (D, D), pre-transposed on host

        attn = jnp.zeros((N, D), jnp.float32)
        for h in range(NHEAD):       # static unroll over heads
            lo = h * HEAD_DIM
            hi = lo + HEAD_DIM
            qh = q3[:, :, lo:hi]     # (B, S, hd)
            kh = k3[:, :, lo:hi]
            vh = v3[:, :, lo:hi]
            # batched over B; contraction on the last dim -> no explicit K transpose
            s = jnp.einsum("bqd,bkd->bqk", qh, kh,
                           preferred_element_type=jnp.float32) * scale
            s = s - jnp.max(s, axis=-1, keepdims=True)
            p = jnp.exp(s)
            p = p / jnp.sum(p, axis=-1, keepdims=True)
            oh = jnp.einsum("bqk,bkd->bqd", p, vh,
                            preferred_element_type=jnp.float32)   # (B, S, hd)
            # fold the output projection per head: removes the head concatenate
            attn = attn + jnp.dot(oh.reshape(N, HEAD_DIM), wo_l[lo:hi, :],
                                  preferred_element_type=jnp.float32)
        attn = attn + bo_ref[l]

        # residual + LayerNorm1
        x1 = _layernorm(x + attn, g1_ref[l], be1_ref[l])

        # FFN: Linear1 -> ReLU -> Linear2  (weights pre-transposed)
        h1 = jnp.dot(x1, w1_ref[l], preferred_element_type=jnp.float32) + bf1_ref[l]
        h1 = jnp.maximum(h1, 0.0)
        h2 = jnp.dot(h1, w2_ref[l], preferred_element_type=jnp.float32) + bf2_ref[l]

        # residual + LayerNorm2
        x = _layernorm(x1 + h2, g2_ref[l], be2_ref[l])

    o_ref[...] = x.astype(o_ref.dtype)


# ------------------ host-side weight packing (layout plumbing) ------------------
def pack_params(layer_params_list):
    """Stack per-layer PyTorch-convention params into the kernel layout:
    pre-transposed matrices, fused Q/K, leading layer axis."""
    def stack(fn):
        return jnp.stack([fn(p) for p in layer_params_list], axis=0)

    return [
        stack(lambda p: jnp.concatenate([p["wq"].T, p["wk"].T], axis=1)),  # wqk_t (L, D, 2D)
        stack(lambda p: jnp.concatenate([p["bq"], p["bk"]], axis=1)),      # bqk   (L, 1, 2D)
        stack(lambda p: p["wv"].T),                                        # wv_t  (L, D, D)
        stack(lambda p: p["bv"]),                                          # bv    (L, 1, D)
        stack(lambda p: p["wo"].T),                                        # wo_t  (L, D, D)
        stack(lambda p: p["bo"]),                                          # bo    (L, 1, D)
        stack(lambda p: p["g1"]),
        stack(lambda p: p["be1"]),
        stack(lambda p: p["w1"].T),                                        # w1_t  (L, D, FF)
        stack(lambda p: p["bf1"]),                                         # bf1   (L, 1, FF)
        stack(lambda p: p["w2"].T),                                        # w2_t  (L, FF, D)
        stack(lambda p: p["bf2"]),
        stack(lambda p: p["g2"]),
        stack(lambda p: p["be2"]),
    ]


@jax.jit
def _encoder_pallas(x_flat, pos_flat, packed):
    """x_flat, pos_flat: (B*S, D). packed: list of stacked pre-transposed weights."""
    return pl.pallas_call(
        encoder_kernel,
        out_shape=jax.ShapeDtypeStruct((N, D), jnp.float32),
    )(x_flat, pos_flat, *packed)


def transformer_encoder_forward(src_sbd, pos_sbd, packed, final_norm=None):
    """src_sbd, pos_sbd: (S, B, D) like PyTorch. Returns (S, B, D)."""
    x = jnp.transpose(src_sbd, (1, 0, 2)).reshape(N, D)
    pos = jnp.transpose(pos_sbd, (1, 0, 2)).reshape(N, D)
    out = _encoder_pallas(x, pos, packed).reshape(B, S, D)
    if final_norm is not None:          # optional encoder-level norm (None in this test)
        g, b = final_norm
        out = _layernorm(out, g, b)
    return jnp.transpose(out, (1, 0, 2))


# ------------------ pure-JAX reference for verification ------------------
def _ref_layer(x_bsd, pos_bsd, p):
    qk_in = x_bsd + pos_bsd
    q = qk_in @ p["wq"].T + p["bq"]
    k = qk_in @ p["wk"].T + p["bk"]
    v = x_bsd @ p["wv"].T + p["bv"]

    def heads(t):  # (B, S, D) -> (B, H, S, hd)
        return t.reshape(B, S, NHEAD, HEAD_DIM).transpose(0, 2, 1, 3)

    qh, kh, vh = heads(q), heads(k), heads(v)
    scores = jnp.einsum("bhqd,bhkd->bhqk", qh, kh) / math.sqrt(HEAD_DIM)
    probs = jax.nn.softmax(scores, axis=-1)
    attn = jnp.einsum("bhqk,bhkd->bhqd", probs, vh)
    attn = attn.transpose(0, 2, 1, 3).reshape(B, S, D)
    attn = attn @ p["wo"].T + p["bo"]

    def ln(t, g, b):
        m = jnp.mean(t, axis=-1, keepdims=True)
        tc = t - m
        v_ = jnp.mean(tc * tc, axis=-1, keepdims=True)
        return tc * jax.lax.rsqrt(v_ + LN_EPS) * g + b

    x1 = ln(x_bsd + attn, p["g1"], p["be1"])
    h1 = jnp.maximum(x1 @ p["w1"].T + p["bf1"], 0.0)
    h2 = h1 @ p["w2"].T + p["bf2"]
    return ln(x1 + h2, p["g2"], p["be2"])


def _ref_encoder(src_sbd, pos_sbd, layer_params_list):
    x = jnp.transpose(src_sbd, (1, 0, 2))
    pos = jnp.transpose(pos_sbd, (1, 0, 2))
    for p in layer_params_list:
        x = _ref_layer(x, pos, p)
    return jnp.transpose(x, (1, 0, 2))


# ------------------ deterministic parameter init ------------------
def make_layer_params(key):
    ks = jax.random.split(key, 8)
    scale = 0.1

    def w(k, shape):
        return (scale * jax.random.normal(k, shape)).astype(jnp.float32)

    return {
        "wq": w(ks[0], (D, D)),  "bq": jnp.zeros((1, D), jnp.float32),
        "wk": w(ks[1], (D, D)),  "bk": jnp.zeros((1, D), jnp.float32),
        "wv": w(ks[2], (D, D)),  "bv": jnp.zeros((1, D), jnp.float32),
        "wo": w(ks[3], (D, D)),  "bo": jnp.zeros((1, D), jnp.float32),
        "g1": jnp.ones((1, D), jnp.float32), "be1": jnp.zeros((1, D), jnp.float32),
        "w1": w(ks[4], (FF, D)), "bf1": jnp.zeros((1, FF), jnp.float32),
        "w2": w(ks[5], (D, FF)), "bf2": jnp.zeros((1, D), jnp.float32),
        "g2": jnp.ones((1, D), jnp.float32), "be2": jnp.zeros((1, D), jnp.float32),
    }


if __name__ == "__main__":
    root = jax.random.PRNGKey(0)
    k_src, k_pos, k_layers = jax.random.split(root, 3)

    src = jax.random.normal(k_src, (S, B, D), dtype=jnp.float32)   # (S, B, D)
    pos = jax.random.normal(k_pos, (S, B, D), dtype=jnp.float32)

    layer_keys = jax.random.split(k_layers, NUM_LAYERS)
    layer_params = [make_layer_params(k) for k in layer_keys]
    packed = pack_params(layer_params)

    out = transformer_encoder_forward(src, pos, packed, final_norm=None)
    out = jax.block_until_ready(out)

    ref = _ref_encoder(src, pos, layer_params)
    assert out.shape == (S, B, D)
    max_diff = float(jnp.max(jnp.abs(out - ref)))
    assert jnp.allclose(out, ref, rtol=1e-4, atol=1e-4), f"max abs diff {max_diff}"

    print("KERNEL_OK")
</pallas_src>

<mosaic_0001>
module attributes {stable_mosaic.version = 11 : i64} {
  func.func @encoder_kernel(%arg0: memref<16x32xf32, #tpu.memory_space<vmem>>, %arg1: memref<16x32xf32, #tpu.memory_space<vmem>>, %arg2: memref<2x32x64xf32, #tpu.memory_space<vmem>>, %arg3: memref<2x1x64xf32, #tpu.memory_space<vmem>>, %arg4: memref<2x32x32xf32, #tpu.memory_space<vmem>>, %arg5: memref<2x1x32xf32, #tpu.memory_space<vmem>>, %arg6: memref<2x32x32xf32, #tpu.memory_space<vmem>>, %arg7: memref<2x1x32xf32, #tpu.memory_space<vmem>>, %arg8: memref<2x1x32xf32, #tpu.memory_space<vmem>>, %arg9: memref<2x1x32xf32, #tpu.memory_space<vmem>>, %arg10: memref<2x32x64xf32, #tpu.memory_space<vmem>>, %arg11: memref<2x1x64xf32, #tpu.memory_space<vmem>>, %arg12: memref<2x64x32xf32, #tpu.memory_space<vmem>>, %arg13: memref<2x1x32xf32, #tpu.memory_space<vmem>>, %arg14: memref<2x1x32xf32, #tpu.memory_space<vmem>>, %arg15: memref<2x1x32xf32, #tpu.memory_space<vmem>>, %arg16: memref<16x32xf32, #tpu.memory_space<vmem>>) attributes {dimension_semantics = [], scalar_prefetch = 0 : i64, scratch_operands = 0 : i64, tpu.core_type = #tpu.core_type<tc>} {
    %c0 = arith.constant 0 : index
    %c0_0 = arith.constant 0 : index
    %0 = vector.load %arg0[%c0, %c0_0] : memref<16x32xf32, #tpu.memory_space<vmem>>, vector<16x32xf32>
    %c0_1 = arith.constant 0 : index
    %c0_2 = arith.constant 0 : index
    %1 = vector.load %arg1[%c0_1, %c0_2] : memref<16x32xf32, #tpu.memory_space<vmem>>, vector<16x32xf32>
    %2 = arith.addf %0, %1 : vector<16x32xf32>
    %c0_3 = arith.constant 0 : index
    %c0_4 = arith.constant 0 : index
    %c0_5 = arith.constant 0 : index
    %3 = vector.load %arg2[%c0_3, %c0_4, %c0_5] : memref<2x32x64xf32, #tpu.memory_space<vmem>>, vector<1x32x64xf32>
    %4 = vector.shape_cast %3 : vector<1x32x64xf32> to vector<32x64xf32>
    %cst = arith.constant dense<0.000000e+00> : vector<16x64xf32>
    %5 = tpu.matmul %2, %4, %cst {dimension_numbers = #tpu.dot_dimension_numbers<[1], [0], [0], [1], [0, 0, 1, 1], [], []>} : vector<16x32xf32>, vector<32x64xf32>, vector<16x64xf32> -> vector<16x64xf32>
    %c0_6 = arith.constant 0 : index
    %c0_7 = arith.constant 0 : index
    %c0_8 = arith.constant 0 : index
    %6 = vector.load %arg3[%c0_6, %c0_7, %c0_8] : memref<2x1x64xf32, #tpu.memory_space<vmem>>, vector<1x1x64xf32>
    %7 = vector.shape_cast %6 : vector<1x1x64xf32> to vector<1x64xf32>
    %8 = vector.broadcast %7 : vector<1x64xf32> to vector<16x64xf32>
    %9 = arith.addf %5, %8 : vector<16x64xf32>
    %10 = vector.extract_strided_slice %9 {offsets = [0, 0], sizes = [16, 32], strides = [1, 1]} : vector<16x64xf32> to vector<16x32xf32>
    %11 = vector.extract_strided_slice %9 {offsets = [0, 32], sizes = [16, 32], strides = [1, 1]} : vector<16x64xf32> to vector<16x32xf32>
    %c0_9 = arith.constant 0 : index
    %c0_10 = arith.constant 0 : index
    %c0_11 = arith.constant 0 : index
    %12 = vector.load %arg4[%c0_9, %c0_10, %c0_11] : memref<2x32x32xf32, #tpu.memory_space<vmem>>, vector<1x32x32xf32>
    %13 = vector.shape_cast %12 : vector<1x32x32xf32> to vector<32x32xf32>
    %cst_12 = arith.constant dense<0.000000e+00> : vector<16x32xf32>
    %14 = tpu.matmul %0, %13, %cst_12 {dimension_numbers = #tpu.dot_dimension_numbers<[1], [0], [0], [1], [0, 0, 1, 1], [], []>} : vector<16x32xf32>, vector<32x32xf32>, vector<16x32xf32> -> vector<16x32xf32>
    %c0_13 = arith.constant 0 : index
    %c0_14 = arith.constant 0 : index
    %c0_15 = arith.constant 0 : index
    %15 = vector.load %arg5[%c0_13, %c0_14, %c0_15] : memref<2x1x32xf32, #tpu.memory_space<vmem>>, vector<1x1x32xf32>
    %16 = vector.shape_cast %15 : vector<1x1x32xf32> to vector<1x32xf32>
    %17 = vector.broadcast %16 : vector<1x32xf32> to vector<16x32xf32>
    %18 = arith.addf %14, %17 : vector<16x32xf32>
    %19 = vector.shape_cast %10 : vector<16x32xf32> to vector<2x8x32xf32>
    %20 = vector.shape_cast %11 : vector<16x32xf32> to vector<2x8x32xf32>
    %21 = vector.shape_cast %18 : vector<16x32xf32> to vector<2x8x32xf32>
    %c0_16 = arith.constant 0 : index
    %c0_17 = arith.constant 0 : index
    %c0_18 = arith.constant 0 : index
    %22 = vector.load %arg6[%c0_16, %c0_17, %c0_18] : memref<2x32x32xf32, #tpu.memory_space<vmem>>, vector<1x32x32xf32>
    %23 = vector.shape_cast %22 : vector<1x32x32xf32> to vector<32x32xf32>
    %cst_19 = arith.constant 0.000000e+00 : f32
    %24 = vector.broadcast %cst_19 : f32 to vector<16x32xf32>
    %25 = vector.extract_strided_slice %19 {offsets = [0, 0, 0], sizes = [2, 8, 8], strides = [1, 1, 1]} : vector<2x8x32xf32> to vector<2x8x8xf32>
    %26 = vector.extract_strided_slice %20 {offsets = [0, 0, 0], sizes = [2, 8, 8], strides = [1, 1, 1]} : vector<2x8x32xf32> to vector<2x8x8xf32>
    %27 = vector.extract_strided_slice %21 {offsets = [0, 0, 0], sizes = [2, 8, 8], strides = [1, 1, 1]} : vector<2x8x32xf32> to vector<2x8x8xf32>
    "tpu.trace_start"() <{level = 10 : i32, message = "bqd,bkd->bqk"}> : () -> ()
    %cst_20 = arith.constant dense<0.000000e+00> : vector<2x8x8xf32>
    %28 = tpu.matmul %25, %26, %cst_20 {dimension_numbers = #tpu.dot_dimension_numbers<[2], [2], [1], [1], [0, 0, 0, 1, 1, 1], [0], [0]>} : vector<2x8x8xf32>, vector<2x8x8xf32>, vector<2x8x8xf32> -> vector<2x8x8xf32>
    "tpu.trace_stop"() : () -> ()
    %cst_21 = arith.constant 0.353553385 : f32
    %29 = vector.broadcast %cst_21 : f32 to vector<2x8x8xf32>
    %30 = arith.mulf %28, %29 : vector<2x8x8xf32>
    %cst_22 = arith.constant dense<0xFF800000> : vector<2x8xf32>
    %31 = vector.multi_reduction <maximumf>, %30, %cst_22 [2] : vector<2x8x8xf32> to vector<2x8xf32>
    %32 = vector.shape_cast %31 : vector<2x8xf32> to vector<2x8x1xf32>
    %33 = vector.broadcast %32 : vector<2x8x1xf32> to vector<2x8x8xf32>
    %34 = arith.subf %30, %33 : vector<2x8x8xf32>
    %35 = math.exp %34 : vector<2x8x8xf32>
    %cst_23 = arith.constant dense<0.000000e+00> : vector<2x8xf32>
    %36 = vector.multi_reduction <add>, %35, %cst_23 [2] : vector<2x8x8xf32> to vector<2x8xf32>
    %37 = vector.shape_cast %36 : vector<2x8xf32> to vector<2x8x1xf32>
    %38 = vector.broadcast %37 : vector<2x8x1xf32> to vector<2x8x8xf32>
    %39 = arith.divf %35, %38 : vector<2x8x8xf32>
    "tpu.trace_start"() <{level = 10 : i32, message = "bqk,bkd->bqd"}> : () -> ()
    %cst_24 = arith.constant dense<0.000000e+00> : vector<2x8x8xf32>
    %40 = tpu.matmul %39, %27, %cst_24 {dimension_numbers = #tpu.dot_dimension_numbers<[2], [1], [1], [2], [0, 0, 0, 1, 1, 2], [0], [0]>} : vector<2x8x8xf32>, vector<2x8x8xf32>, vector<2x8x8xf32> -> vector<2x8x8xf32>
    "tpu.trace_stop"() : () -> ()
    %41 = vector.shape_cast %40 : vector<2x8x8xf32> to vector<16x8xf32>
    %42 = vector.extract_strided_slice %23 {offsets = [0, 0], sizes = [8, 32], strides = [1, 1]} : vector<32x32xf32> to vector<8x32xf32>
    %cst_25 = arith.constant dense<0.000000e+00> : vector<16x32xf32>
    %43 = tpu.matmul %41, %42, %cst_25 {dimension_numbers = #tpu.dot_dimension_numbers<[1], [0], [0], [1], [0, 0, 1, 1], [], []>} : vector<16x8xf32>, vector<8x32xf32>, vector<16x32xf32> -> vector<16x32xf32>
    %44 = arith.addf %24, %43 : vector<16x32xf32>
    %45 = vector.extract_strided_slice %19 {offsets = [0, 0, 8], sizes = [2, 8, 8], strides = [1, 1, 1]} : vector<2x8x32xf32> to vector<2x8x8xf32>
    %46 = vector.extract_strided_slice %20 {offsets = [0, 0, 8], sizes = [2, 8, 8], strides = [1, 1, 1]} : vector<2x8x32xf32> to vector<2x8x8xf32>
    %47 = vector.extract_strided_slice %21 {offsets = [0, 0, 8], sizes = [2, 8, 8], strides = [1, 1, 1]} : vector<2x8x32xf32> to vector<2x8x8xf32>
    "tpu.trace_start"() <{level = 10 : i32, message = "bqd,bkd->bqk"}> : () -> ()
    %cst_26 = arith.constant dense<0.000000e+00> : vector<2x8x8xf32>
    %48 = tpu.matmul %45, %46, %cst_26 {dimension_numbers = #tpu.dot_dimension_numbers<[2], [2], [1], [1], [0, 0, 0, 1, 1, 1], [0], [0]>} : vector<2x8x8xf32>, vector<2x8x8xf32>, vector<2x8x8xf32> -> vector<2x8x8xf32>
    "tpu.trace_stop"() : () -> ()
    %cst_27 = arith.constant 0.353553385 : f32
    %49 = vector.broadcast %cst_27 : f32 to vector<2x8x8xf32>
    %50 = arith.mulf %48, %49 : vector<2x8x8xf32>
    %cst_28 = arith.constant dense<0xFF800000> : vector<2x8xf32>
    %51 = vector.multi_reduction <maximumf>, %50, %cst_28 [2] : vector<2x8x8xf32> to vector<2x8xf32>
    %52 = vector.shape_cast %51 : vector<2x8xf32> to vector<2x8x1xf32>
    %53 = vector.broadcast %52 : vector<2x8x1xf32> to vector<2x8x8xf32>
    %54 = arith.subf %50, %53 : vector<2x8x8xf32>
    %55 = math.exp %54 : vector<2x8x8xf32>
    %cst_29 = arith.constant dense<0.000000e+00> : vector<2x8xf32>
    %56 = vector.multi_reduction <add>, %55, %cst_29 [2] : vector<2x8x8xf32> to vector<2x8xf32>
    %57 = vector.shape_cast %56 : vector<2x8xf32> to vector<2x8x1xf32>
    %58 = vector.broadcast %57 : vector<2x8x1xf32> to vector<2x8x8xf32>
    %59 = arith.divf %55, %58 : vector<2x8x8xf32>
    "tpu.trace_start"() <{level = 10 : i32, message = "bqk,bkd->bqd"}> : () -> ()
    %cst_30 = arith.constant dense<0.000000e+00> : vector<2x8x8xf32>
    %60 = tpu.matmul %59, %47, %cst_30 {dimension_numbers = #tpu.dot_dimension_numbers<[2], [1], [1], [2], [0, 0, 0, 1, 1, 2], [0], [0]>} : vector<2x8x8xf32>, vector<2x8x8xf32>, vector<2x8x8xf32> -> vector<2x8x8xf32>
    "tpu.trace_stop"() : () -> ()
    %61 = vector.shape_cast %60 : vector<2x8x8xf32> to vector<16x8xf32>
    %62 = vector.extract_strided_slice %23 {offsets = [8, 0], sizes = [8, 32], strides = [1, 1]} : vector<32x32xf32> to vector<8x32xf32>
    %cst_31 = arith.constant dense<0.000000e+00> : vector<16x32xf32>
    %63 = tpu.matmul %61, %62, %cst_31 {dimension_numbers = #tpu.dot_dimension_numbers<[1], [0], [0], [1], [0, 0, 1, 1], [], []>} : vector<16x8xf32>, vector<8x32xf32>, vector<16x32xf32> -> vector<16x32xf32>
    %64 = arith.addf %44, %63 : vector<16x32xf32>
    %65 = vector.extract_strided_slice %19 {offsets = [0, 0, 16], sizes = [2, 8, 8], strides = [1, 1, 1]} : vector<2x8x32xf32> to vector<2x8x8xf32>
    %66 = vector.extract_strided_slice %20 {offsets = [0, 0, 16], sizes = [2, 8, 8], strides = [1, 1, 1]} : vector<2x8x32xf32> to vector<2x8x8xf32>
    %67 = vector.extract_strided_slice %21 {offsets = [0, 0, 16], sizes = [2, 8, 8], strides = [1, 1, 1]} : vector<2x8x32xf32> to vector<2x8x8xf32>
    "tpu.trace_start"() <{level = 10 : i32, message = "bqd,bkd->bqk"}> : () -> ()
    %cst_32 = arith.constant dense<0.000000e+00> : vector<2x8x8xf32>
    %68 = tpu.matmul %65, %66, %cst_32 {dimension_numbers = #tpu.dot_dimension_numbers<[2], [2], [1], [1], [0, 0, 0, 1, 1, 1], [0], [0]>} : vector<2x8x8xf32>, vector<2x8x8xf32>, vector<2x8x8xf32> -> vector<2x8x8xf32>
    "tpu.trace_stop"() : () -> ()
    %cst_33 = arith.constant 0.353553385 : f32
    %69 = vector.broadcast %cst_33 : f32 to vector<2x8x8xf32>
    %70 = arith.mulf %68, %69 : vector<2x8x8xf32>
    %cst_34 = arith.constant dense<0xFF800000> : vector<2x8xf32>
    %71 = vector.multi_reduction <maximumf>, %70, %cst_34 [2] : vector<2x8x8xf32> to vector<2x8xf32>
    %72 = vector.shape_cast %71 : vector<2x8xf32> to vector<2x8x1xf32>
    %73 = vector.broadcast %72 : vector<2x8x1xf32> to vector<2x8x8xf32>
    %74 = arith.subf %70, %73 : vector<2x8x8xf32>
    %75 = math.exp %74 : vector<2x8x8xf32>
    %cst_35 = arith.constant dense<0.000000e+00> : vector<2x8xf32>
    %76 = vector.multi_reduction <add>, %75, %cst_35 [2] : vector<2x8x8xf32> to vector<2x8xf32>
    %77 = vector.shape_cast %76 : vector<2x8xf32> to vector<2x8x1xf32>
    %78 = vector.broadcast %77 : vector<2x8x1xf32> to vector<2x8x8xf32>
    %79 = arith.divf %75, %78 : vector<2x8x8xf32>
    "tpu.trace_start"() <{level = 10 : i32, message = "bqk,bkd->bqd"}> : () -> ()
    %cst_36 = arith.constant dense<0.000000e+00> : vector<2x8x8xf32>
    %80 = tpu.matmul %79, %67, %cst_36 {dimension_numbers = #tpu.dot_dimension_numbers<[2], [1], [1], [2], [0, 0, 0, 1, 1, 2], [0], [0]>} : vector<2x8x8xf32>, vector<2x8x8xf32>, vector<2x8x8xf32> -> vector<2x8x8xf32>
    "tpu.trace_stop"() : () -> ()
    %81 = vector.shape_cast %80 : vector<2x8x8xf32> to vector<16x8xf32>
    %82 = vector.extract_strided_slice %23 {offsets = [16, 0], sizes = [8, 32], strides = [1, 1]} : vector<32x32xf32> to vector<8x32xf32>
    %cst_37 = arith.constant dense<0.000000e+00> : vector<16x32xf32>
    %83 = tpu.matmul %81, %82, %cst_37 {dimension_numbers = #tpu.dot_dimension_numbers<[1], [0], [0], [1], [0, 0, 1, 1], [], []>} : vector<16x8xf32>, vector<8x32xf32>, vector<16x32xf32> -> vector<16x32xf32>
    %84 = arith.addf %64, %83 : vector<16x32xf32>
    %85 = vector.extract_strided_slice %19 {offsets = [0, 0, 24], sizes = [2, 8, 8], strides = [1, 1, 1]} : vector<2x8x32xf32> to vector<2x8x8xf32>
    %86 = vector.extract_strided_slice %20 {offsets = [0, 0, 24], sizes = [2, 8, 8], strides = [1, 1, 1]} : vector<2x8x32xf32> to vector<2x8x8xf32>
    %87 = vector.extract_strided_slice %21 {offsets = [0, 0, 24], sizes = [2, 8, 8], strides = [1, 1, 1]} : vector<2x8x32xf32> to vector<2x8x8xf32>
    "tpu.trace_start"() <{level = 10 : i32, message = "bqd,bkd->bqk"}> : () -> ()
    %cst_38 = arith.constant dense<0.000000e+00> : vector<2x8x8xf32>
    %88 = tpu.matmul %85, %86, %cst_38 {dimension_numbers = #tpu.dot_dimension_numbers<[2], [2], [1], [1], [0, 0, 0, 1, 1, 1], [0], [0]>} : vector<2x8x8xf32>, vector<2x8x8xf32>, vector<2x8x8xf32> -> vector<2x8x8xf32>
    "tpu.trace_stop"() : () -> ()
    %cst_39 = arith.constant 0.353553385 : f32
    %89 = vector.broadcast %cst_39 : f32 to vector<2x8x8xf32>
    %90 = arith.mulf %88, %89 : vector<2x8x8xf32>
    %cst_40 = arith.constant dense<0xFF800000> : vector<2x8xf32>
    %91 = vector.multi_reduction <maximumf>, %90, %cst_40 [2] : vector<2x8x8xf32> to vector<2x8xf32>
    %92 = vector.shape_cast %91 : vector<2x8xf32> to vector<2x8x1xf32>
    %93 = vector.broadcast %92 : vector<2x8x1xf32> to vector<2x8x8xf32>
    %94 = arith.subf %90, %93 : vector<2x8x8xf32>
    %95 = math.exp %94 : vector<2x8x8xf32>
    %cst_41 = arith.constant dense<0.000000e+00> : vector<2x8xf32>
    %96 = vector.multi_reduction <add>, %95, %cst_41 [2] : vector<2x8x8xf32> to vector<2x8xf32>
    %97 = vector.shape_cast %96 : vector<2x8xf32> to vector<2x8x1xf32>
    %98 = vector.broadcast %97 : vector<2x8x1xf32> to vector<2x8x8xf32>
    %99 = arith.divf %95, %98 : vector<2x8x8xf32>
    "tpu.trace_start"() <{level = 10 : i32, message = "bqk,bkd->bqd"}> : () -> ()
    %cst_42 = arith.constant dense<0.000000e+00> : vector<2x8x8xf32>
    %100 = tpu.matmul %99, %87, %cst_42 {dimension_numbers = #tpu.dot_dimension_numbers<[2], [1], [1], [2], [0, 0, 0, 1, 1, 2], [0], [0]>} : vector<2x8x8xf32>, vector<2x8x8xf32>, vector<2x8x8xf32> -> vector<2x8x8xf32>
    "tpu.trace_stop"() : () -> ()
    %101 = vector.shape_cast %100 : vector<2x8x8xf32> to vector<16x8xf32>
    %102 = vector.extract_strided_slice %23 {offsets = [24, 0], sizes = [8, 32], strides = [1, 1]} : vector<32x32xf32> to vector<8x32xf32>
    %cst_43 = arith.constant dense<0.000000e+00> : vector<16x32xf32>
    %103 = tpu.matmul %101, %102, %cst_43 {dimension_numbers = #tpu.dot_dimension_numbers<[1], [0], [0], [1], [0, 0, 1, 1], [], []>} : vector<16x8xf32>, vector<8x32xf32>, vector<16x32xf32> -> vector<16x32xf32>
    %104 = arith.addf %84, %103 : vector<16x32xf32>
    %c0_44 = arith.constant 0 : index
    %c0_45 = arith.constant 0 : index
    %c0_46 = arith.constant 0 : index
    %105 = vector.load %arg7[%c0_44, %c0_45, %c0_46] : memref<2x1x32xf32, #tpu.memory_space<vmem>>, vector<1x1x32xf32>
    %106 = vector.shape_cast %105 : vector<1x1x32xf32> to vector<1x32xf32>
    %107 = vector.broadcast %106 : vector<1x32xf32> to vector<16x32xf32>
    %108 = arith.addf %104, %107 : vector<16x32xf32>
    %109 = arith.addf %0, %108 : vector<16x32xf32>
    %c0_47 = arith.constant 0 : index
    %c0_48 = arith.constant 0 : index
    %c0_49 = arith.constant 0 : index
    %110 = vector.load %arg8[%c0_47, %c0_48, %c0_49] : memref<2x1x32xf32, #tpu.memory_space<vmem>>, vector<1x1x32xf32>
    %111 = vector.shape_cast %110 : vector<1x1x32xf32> to vector<1x32xf32>
    %c0_50 = arith.constant 0 : index
    %c0_51 = arith.constant 0 : index
    %c0_52 = arith.constant 0 : index
    %112 = vector.load %arg9[%c0_50, %c0_51, %c0_52] : memref<2x1x32xf32, #tpu.memory_space<vmem>>, vector<1x1x32xf32>
    %113 = vector.shape_cast %112 : vector<1x1x32xf32> to vector<1x32xf32>
    %cst_53 = arith.constant dense<0.000000e+00> : vector<16xf32>
    %114 = vector.multi_reduction <add>, %109, %cst_53 [1] : vector<16x32xf32> to vector<16xf32>
    %115 = vector.shape_cast %114 : vector<16xf32> to vector<16x1xf32>
    %cst_54 = arith.constant 3.200000e+01 : f32
    %116 = vector.broadcast %cst_54 : f32 to vector<16x1xf32>
    %117 = arith.divf %115, %116 : vector<16x1xf32>
    %118 = vector.broadcast %117 : vector<16x1xf32> to vector<16x32xf32>
    %119 = arith.subf %109, %118 : vector<16x32xf32>
    %120 = arith.mulf %119, %119 : vector<16x32xf32>
    %cst_55 = arith.constant dense<0.000000e+00> : vector<16xf32>
    %121 = vector.multi_reduction <add>, %120, %cst_55 [1] : vector<16x32xf32> to vector<16xf32>
    %122 = vector.shape_cast %121 : vector<16xf32> to vector<16x1xf32>
    %cst_56 = arith.constant 3.200000e+01 : f32
    %123 = vector.broadcast %cst_56 : f32 to vector<16x1xf32>
    %124 = arith.divf %122, %123 : vector<16x1xf32>
    %cst_57 = arith.constant 9.99999974E-6 : f32
    %125 = vector.broadcast %cst_57 : f32 to vector<16x1xf32>
    %126 = arith.addf %124, %125 : vector<16x1xf32>
    %127 = math.rsqrt %126 : vector<16x1xf32>
    %128 = vector.broadcast %127 : vector<16x1xf32> to vector<16x32xf32>
    %129 = arith.mulf %119, %128 : vector<16x32xf32>
    %130 = vector.broadcast %111 : vector<1x32xf32> to vector<16x32xf32>
    %131 = arith.mulf %129, %130 : vector<16x32xf32>
    %132 = vector.broadcast %113 : vector<1x32xf32> to vector<16x32xf32>
    %133 = arith.addf %131, %132 : vector<16x32xf32>
    %c0_58 = arith.constant 0 : index
    %c0_59 = arith.constant 0 : index
    %c0_60 = arith.constant 0 : index
    %134 = vector.load %arg10[%c0_58, %c0_59, %c0_60] : memref<2x32x64xf32, #tpu.memory_space<vmem>>, vector<1x32x64xf32>
    %135 = vector.shape_cast %134 : vector<1x32x64xf32> to vector<32x64xf32>
    %cst_61 = arith.constant dense<0.000000e+00> : vector<16x64xf32>
    %136 = tpu.matmul %133, %135, %cst_61 {dimension_numbers = #tpu.dot_dimension_numbers<[1], [0], [0], [1], [0, 0, 1, 1], [], []>} : vector<16x32xf32>, vector<32x64xf32>, vector<16x64xf32> -> vector<16x64xf32>
    %c0_62 = arith.constant 0 : index
    %c0_63 = arith.constant 0 : index
    %c0_64 = arith.constant 0 : index
    %137 = vector.load %arg11[%c0_62, %c0_63, %c0_64] : memref<2x1x64xf32, #tpu.memory_space<vmem>>, vector<1x1x64xf32>
    %138 = vector.shape_cast %137 : vector<1x1x64xf32> to vector<1x64xf32>
    %139 = vector.broadcast %138 : vector<1x64xf32> to vector<16x64xf32>
    %140 = arith.addf %136, %139 : vector<16x64xf32>
    %cst_65 = arith.constant 0.000000e+00 : f32
    %141 = vector.broadcast %cst_65 : f32 to vector<16x64xf32>
    %142 = arith.maximumf %140, %141 : vector<16x64xf32>
    %c0_66 = arith.constant 0 : index
    %c0_67 = arith.constant 0 : index
    %c0_68 = arith.constant 0 : index
    %143 = vector.load %arg12[%c0_66, %c0_67, %c0_68] : memref<2x64x32xf32, #tpu.memory_space<vmem>>, vector<1x64x32xf32>
    %144 = vector.shape_cast %143 : vector<1x64x32xf32> to vector<64x32xf32>
    %cst_69 = arith.constant dense<0.000000e+00> : vector<16x32xf32>
    %145 = tpu.matmul %142, %144, %cst_69 {dimension_numbers = #tpu.dot_dimension_numbers<[1], [0], [0], [1], [0, 0, 1, 1], [], []>} : vector<16x64xf32>, vector<64x32xf32>, vector<16x32xf32> -> vector<16x32xf32>
    %c0_70 = arith.constant 0 : index
    %c0_71 = arith.constant 0 : index
    %c0_72 = arith.constant 0 : index
    %146 = vector.load %arg13[%c0_70, %c0_71, %c0_72] : memref<2x1x32xf32, #tpu.memory_space<vmem>>, vector<1x1x32xf32>
    %147 = vector.shape_cast %146 : vector<1x1x32xf32> to vector<1x32xf32>
    %148 = vector.broadcast %147 : vector<1x32xf32> to vector<16x32xf32>
    %149 = arith.addf %145, %148 : vector<16x32xf32>
    %150 = arith.addf %133, %149 : vector<16x32xf32>
    %c0_73 = arith.constant 0 : index
    %c0_74 = arith.constant 0 : index
    %c0_75 = arith.constant 0 : index
    %151 = vector.load %arg14[%c0_73, %c0_74, %c0_75] : memref<2x1x32xf32, #tpu.memory_space<vmem>>, vector<1x1x32xf32>
    %152 = vector.shape_cast %151 : vector<1x1x32xf32> to vector<1x32xf32>
    %c0_76 = arith.constant 0 : index
    %c0_77 = arith.constant 0 : index
    %c0_78 = arith.constant 0 : index
    %153 = vector.load %arg15[%c0_76, %c0_77, %c0_78] : memref<2x1x32xf32, #tpu.memory_space<vmem>>, vector<1x1x32xf32>
    %154 = vector.shape_cast %153 : vector<1x1x32xf32> to vector<1x32xf32>
    %cst_79 = arith.constant dense<0.000000e+00> : vector<16xf32>
    %155 = vector.multi_reduction <add>, %150, %cst_79 [1] : vector<16x32xf32> to vector<16xf32>
    %156 = vector.shape_cast %155 : vector<16xf32> to vector<16x1xf32>
    %cst_80 = arith.constant 3.200000e+01 : f32
    %157 = vector.broadcast %cst_80 : f32 to vector<16x1xf32>
    %158 = arith.divf %156, %157 : vector<16x1xf32>
    %159 = vector.broadcast %158 : vector<16x1xf32> to vector<16x32xf32>
    %160 = arith.subf %150, %159 : vector<16x32xf32>
    %161 = arith.mulf %160, %160 : vector<16x32xf32>
    %cst_81 = arith.constant dense<0.000000e+00> : vector<16xf32>
    %162 = vector.multi_reduction <add>, %161, %cst_81 [1] : vector<16x32xf32> to vector<16xf32>
    %163 = vector.shape_cast %162 : vector<16xf32> to vector<16x1xf32>
    %cst_82 = arith.constant 3.200000e+01 : f32
    %164 = vector.broadcast %cst_82 : f32 to vector<16x1xf32>
    %165 = arith.divf %163, %164 : vector<16x1xf32>
    %cst_83 = arith.constant 9.99999974E-6 : f32
    %166 = vector.broadcast %cst_83 : f32 to vector<16x1xf32>
    %167 = arith.addf %165, %166 : vector<16x1xf32>
    %168 = math.rsqrt %167 : vector<16x1xf32>
    %169 = vector.broadcast %168 : vector<16x1xf32> to vector<16x32xf32>
    %170 = arith.mulf %160, %169 : vector<16x32xf32>
    %171 = vector.broadcast %152 : vector<1x32xf32> to vector<16x32xf32>
    %172 = arith.mulf %170, %171 : vector<16x32xf32>
    %173 = vector.broadcast %154 : vector<1x32xf32> to vector<16x32xf32>
    %174 = arith.addf %172, %173 : vector<16x32xf32>
    %175 = arith.addf %174, %1 : vector<16x32xf32>
    %c1 = arith.constant 1 : index
    %c0_84 = arith.constant 0 : index
    %c0_85 = arith.constant 0 : index
    %176 = vector.load %arg2[%c1, %c0_84, %c0_85] : memref<2x32x64xf32, #tpu.memory_space<vmem>>, vector<1x32x64xf32>
    %177 = vector.shape_cast %176 : vector<1x32x64xf32> to vector<32x64xf32>
    %cst_86 = arith.constant dense<0.000000e+00> : vector<16x64xf32>
    %178 = tpu.matmul %175, %177, %cst_86 {dimension_numbers = #tpu.dot_dimension_numbers<[1], [0], [0], [1], [0, 0, 1, 1], [], []>} : vector<16x32xf32>, vector<32x64xf32>, vector<16x64xf32> -> vector<16x64xf32>
    %c1_87 = arith.constant 1 : index
    %c0_88 = arith.constant 0 : index
    %c0_89 = arith.constant 0 : index
    %179 = vector.load %arg3[%c1_87, %c0_88, %c0_89] : memref<2x1x64xf32, #tpu.memory_space<vmem>>, vector<1x1x64xf32>
    %180 = vector.shape_cast %179 : vector<1x1x64xf32> to vector<1x64xf32>
    %181 = vector.broadcast %180 : vector<1x64xf32> to vector<16x64xf32>
    %182 = arith.addf %178, %181 : vector<16x64xf32>
    %183 = vector.extract_strided_slice %182 {offsets = [0, 0], sizes = [16, 32], strides = [1, 1]} : vector<16x64xf32> to vector<16x32xf32>
    %184 = vector.extract_strided_slice %182 {offsets = [0, 32], sizes = [16, 32], strides = [1, 1]} : vector<16x64xf32> to vector<16x32xf32>
    %c1_90 = arith.constant 1 : index
    %c0_91 = arith.constant 0 : index
    %c0_92 = arith.constant 0 : index
    %185 = vector.load %arg4[%c1_90, %c0_91, %c0_92] : memref<2x32x32xf32, #tpu.memory_space<vmem>>, vector<1x32x32xf32>
    %186 = vector.shape_cast %185 : vector<1x32x32xf32> to vector<32x32xf32>
    %cst_93 = arith.constant dense<0.000000e+00> : vector<16x32xf32>
    %187 = tpu.matmul %174, %186, %cst_93 {dimension_numbers = #tpu.dot_dimension_numbers<[1], [0], [0], [1], [0, 0, 1, 1], [], []>} : vector<16x32xf32>, vector<32x32xf32>, vector<16x32xf32> -> vector<16x32xf32>
    %c1_94 = arith.constant 1 : index
    %c0_95 = arith.constant 0 : index
    %c0_96 = arith.constant 0 : index
    %188 = vector.load %arg5[%c1_94, %c0_95, %c0_96] : memref<2x1x32xf32, #tpu.memory_space<vmem>>, vector<1x1x32xf32>
    %189 = vector.shape_cast %188 : vector<1x1x32xf32> to vector<1x32xf32>
    %190 = vector.broadcast %189 : vector<1x32xf32> to vector<16x32xf32>
    %191 = arith.addf %187, %190 : vector<16x32xf32>
    %192 = vector.shape_cast %183 : vector<16x32xf32> to vector<2x8x32xf32>
    %193 = vector.shape_cast %184 : vector<16x32xf32> to vector<2x8x32xf32>
    %194 = vector.shape_cast %191 : vector<16x32xf32> to vector<2x8x32xf32>
    %c1_97 = arith.constant 1 : index
    %c0_98 = arith.constant 0 : index
    %c0_99 = arith.constant 0 : index
    %195 = vector.load %arg6[%c1_97, %c0_98, %c0_99] : memref<2x32x32xf32, #tpu.memory_space<vmem>>, vector<1x32x32xf32>
    %196 = vector.shape_cast %195 : vector<1x32x32xf32> to vector<32x32xf32>
    %cst_100 = arith.constant 0.000000e+00 : f32
    %197 = vector.broadcast %cst_100 : f32 to vector<16x32xf32>
    %198 = vector.extract_strided_slice %192 {offsets = [0, 0, 0], sizes = [2, 8, 8], strides = [1, 1, 1]} : vector<2x8x32xf32> to vector<2x8x8xf32>
    %199 = vector.extract_strided_slice %193 {offsets = [0, 0, 0], sizes = [2, 8, 8], strides = [1, 1, 1]} : vector<2x8x32xf32> to vector<2x8x8xf32>
    %200 = vector.extract_strided_slice %194 {offsets = [0, 0, 0], sizes = [2, 8, 8], strides = [1, 1, 1]} : vector<2x8x32xf32> to vector<2x8x8xf32>
    "tpu.trace_start"() <{level = 10 : i32, message = "bqd,bkd->bqk"}> : () -> ()
    %cst_101 = arith.constant dense<0.000000e+00> : vector<2x8x8xf32>
    %201 = tpu.matmul %198, %199, %cst_101 {dimension_numbers = #tpu.dot_dimension_numbers<[2], [2], [1], [1], [0, 0, 0, 1, 1, 1], [0], [0]>} : vector<2x8x8xf32>, vector<2x8x8xf32>, vector<2x8x8xf32> -> vector<2x8x8xf32>
    "tpu.trace_stop"() : () -> ()
    %cst_102 = arith.constant 0.353553385 : f32
    %202 = vector.broadcast %cst_102 : f32 to vector<2x8x8xf32>
    %203 = arith.mulf %201, %202 : vector<2x8x8xf32>
    %cst_103 = arith.constant dense<0xFF800000> : vector<2x8xf32>
    %204 = vector.multi_reduction <maximumf>, %203, %cst_103 [2] : vector<2x8x8xf32> to vector<2x8xf32>
    %205 = vector.shape_cast %204 : vector<2x8xf32> to vector<2x8x1xf32>
    %206 = vector.broadcast %205 : vector<2x8x1xf32> to vector<2x8x8xf32>
    %207 = arith.subf %203, %206 : vector<2x8x8xf32>
    %208 = math.exp %207 : vector<2x8x8xf32>
    %cst_104 = arith.constant dense<0.000000e+00> : vector<2x8xf32>
    %209 = vector.multi_reduction <add>, %208, %cst_104 [2] : vector<2x8x8xf32> to vector<2x8xf32>
    %210 = vector.shape_cast %209 : vector<2x8xf32> to vector<2x8x1xf32>
    %211 = vector.broadcast %210 : vector<2x8x1xf32> to vector<2x8x8xf32>
    %212 = arith.divf %208, %211 : vector<2x8x8xf32>
    "tpu.trace_start"() <{level = 10 : i32, message = "bqk,bkd->bqd"}> : () -> ()
    %cst_105 = arith.constant dense<0.000000e+00> : vector<2x8x8xf32>
    %213 = tpu.matmul %212, %200, %cst_105 {dimension_numbers = #tpu.dot_dimension_numbers<[2], [1], [1], [2], [0, 0, 0, 1, 1, 2], [0], [0]>} : vector<2x8x8xf32>, vector<2x8x8xf32>, vector<2x8x8xf32> -> vector<2x8x8xf32>
    "tpu.trace_stop"() : () -> ()
    %214 = vector.shape_cast %213 : vector<2x8x8xf32> to vector<16x8xf32>
    %215 = vector.extract_strided_slice %196 {offsets = [0, 0], sizes = [8, 32], strides = [1, 1]} : vector<32x32xf32> to vector<8x32xf32>
    %cst_106 = arith.constant dense<0.000000e+00> : vector<16x32xf32>
    %216 = tpu.matmul %214, %215, %cst_106 {dimension_numbers = #tpu.dot_dimension_numbers<[1], [0], [0], [1], [0, 0, 1, 1], [], []>} : vector<16x8xf32>, vector<8x32xf32>, vector<16x32xf32> -> vector<16x32xf32>
    %217 = arith.addf %197, %216 : vector<16x32xf32>
    %218 = vector.extract_strided_slice %192 {offsets = [0, 0, 8], sizes = [2, 8, 8], strides = [1, 1, 1]} : vector<2x8x32xf32> to vector<2x8x8xf32>
    %219 = vector.extract_strided_slice %193 {offsets = [0, 0, 8], sizes = [2, 8, 8], strides = [1, 1, 1]} : vector<2x8x32xf32> to vector<2x8x8xf32>
    %220 = vector.extract_strided_slice %194 {offsets = [0, 0, 8], sizes = [2, 8, 8], strides = [1, 1, 1]} : vector<2x8x32xf32> to vector<2x8x8xf32>
    "tpu.trace_start"() <{level = 10 : i32, message = "bqd,bkd->bqk"}> : () -> ()
    %cst_107 = arith.constant dense<0.000000e+00> : vector<2x8x8xf32>
    %221 = tpu.matmul %218, %219, %cst_107 {dimension_numbers = #tpu.dot_dimension_numbers<[2], [2], [1], [1], [0, 0, 0, 1, 1, 1], [0], [0]>} : vector<2x8x8xf32>, vector<2x8x8xf32>, vector<2x8x8xf32> -> vector<2x8x8xf32>
    "tpu.trace_stop"() : () -> ()
    %cst_108 = arith.constant 0.353553385 : f32
    %222 = vector.broadcast %cst_108 : f32 to vector<2x8x8xf32>
    %223 = arith.mulf %221, %222 : vector<2x8x8xf32>
    %cst_109 = arith.constant dense<0xFF800000> : vector<2x8xf32>
    %224 = vector.multi_reduction <maximumf>, %223, %cst_109 [2] : vector<2x8x8xf32> to vector<2x8xf32>
    %225 = vector.shape_cast %224 : vector<2x8xf32> to vector<2x8x1xf32>
    %226 = vector.broadcast %225 : vector<2x8x1xf32> to vector<2x8x8xf32>
    %227 = arith.subf %223, %226 : vector<2x8x8xf32>
    %228 = math.exp %227 : vector<2x8x8xf32>
    %cst_110 = arith.constant dense<0.000000e+00> : vector<2x8xf32>
    %229 = vector.multi_reduction <add>, %228, %cst_110 [2] : vector<2x8x8xf32> to vector<2x8xf32>
    %230 = vector.shape_cast %229 : vector<2x8xf32> to vector<2x8x1xf32>
    %231 = vector.broadcast %230 : vector<2x8x1xf32> to vector<2x8x8xf32>
    %232 = arith.divf %228, %231 : vector<2x8x8xf32>
    "tpu.trace_start"() <{level = 10 : i32, message = "bqk,bkd->bqd"}> : () -> ()
    %cst_111 = arith.constant dense<0.000000e+00> : vector<2x8x8xf32>
    %233 = tpu.matmul %232, %220, %cst_111 {dimension_numbers = #tpu.dot_dimension_numbers<[2], [1], [1], [2], [0, 0, 0, 1, 1, 2], [0], [0]>} : vector<2x8x8xf32>, vector<2x8x8xf32>, vector<2x8x8xf32> -> vector<2x8x8xf32>
    "tpu.trace_stop"() : () -> ()
    %234 = vector.shape_cast %233 : vector<2x8x8xf32> to vector<16x8xf32>
    %235 = vector.extract_strided_slice %196 {offsets = [8, 0], sizes = [8, 32], strides = [1, 1]} : vector<32x32xf32> to vector<8x32xf32>
    %cst_112 = arith.constant dense<0.000000e+00> : vector<16x32xf32>
    %236 = tpu.matmul %234, %235, %cst_112 {dimension_numbers = #tpu.dot_dimension_numbers<[1], [0], [0], [1], [0, 0, 1, 1], [], []>} : vector<16x8xf32>, vector<8x32xf32>, vector<16x32xf32> -> vector<16x32xf32>
    %237 = arith.addf %217, %236 : vector<16x32xf32>
    %238 = vector.extract_strided_slice %192 {offsets = [0, 0, 16], sizes = [2, 8, 8], strides = [1, 1, 1]} : vector<2x8x32xf32> to vector<2x8x8xf32>
    %239 = vector.extract_strided_slice %193 {offsets = [0, 0, 16], sizes = [2, 8, 8], strides = [1, 1, 1]} : vector<2x8x32xf32> to vector<2x8x8xf32>
    %240 = vector.extract_strided_slice %194 {offsets = [0, 0, 16], sizes = [2, 8, 8], strides = [1, 1, 1]} : vector<2x8x32xf32> to vector<2x8x8xf32>
    "tpu.trace_start"() <{level = 10 : i32, message = "bqd,bkd->bqk"}> : () -> ()
    %cst_113 = arith.constant dense<0.000000e+00> : vector<2x8x8xf32>
    %241 = tpu.matmul %238, %239, %cst_113 {dimension_numbers = #tpu.dot_dimension_numbers<[2], [2], [1], [1], [0, 0, 0, 1, 1, 1], [0], [0]>} : vector<2x8x8xf32>, vector<2x8x8xf32>, vector<2x8x8xf32> -> vector<2x8x8xf32>
    "tpu.trace_stop"() : () -> ()
    %cst_114 = arith.constant 0.353553385 : f32
    %242 = vector.broadcast %cst_114 : f32 to vector<2x8x8xf32>
    %243 = arith.mulf %241, %242 : vector<2x8x8xf32>
    %cst_115 = arith.constant dense<0xFF800000> : vector<2x8xf32>
    %244 = vector.multi_reduction <maximumf>, %243, %cst_115 [2] : vector<2x8x8xf32> to vector<2x8xf32>
    %245 = vector.shape_cast %244 : vector<2x8xf32> to vector<2x8x1xf32>
    %246 = vector.broadcast %245 : vector<2x8x1xf32> to vector<2x8x8xf32>
    %247 = arith.subf %243, %246 : vector<2x8x8xf32>
    %248 = math.exp %247 : vector<2x8x8xf32>
    %cst_116 = arith.constant dense<0.000000e+00> : vector<2x8xf32>
    %249 = vector.multi_reduction <add>, %248, %cst_116 [2] : vector<2x8x8xf32> to vector<2x8xf32>
    %250 = vector.shape_cast %249 : vector<2x8xf32> to vector<2x8x1xf32>
    %251 = vector.broadcast %250 : vector<2x8x1xf32> to vector<2x8x8xf32>
    %252 = arith.divf %248, %251 : vector<2x8x8xf32>
    "tpu.trace_start"() <{level = 10 : i32, message = "bqk,bkd->bqd"}> : () -> ()
    %cst_117 = arith.constant dense<0.000000e+00> : vector<2x8x8xf32>
    %253 = tpu.matmul %252, %240, %cst_117 {dimension_numbers = #tpu.dot_dimension_numbers<[2], [1], [1], [2], [0, 0, 0, 1, 1, 2], [0], [0]>} : vector<2x8x8xf32>, vector<2x8x8xf32>, vector<2x8x8xf32> -> vector<2x8x8xf32>
    "tpu.trace_stop"() : () -> ()
    %254 = vector.shape_cast %253 : vector<2x8x8xf32> to vector<16x8xf32>
    %255 = vector.extract_strided_slice %196 {offsets = [16, 0], sizes = [8, 32], strides = [1, 1]} : vector<32x32xf32> to vector<8x32xf32>
    %cst_118 = arith.constant dense<0.000000e+00> : vector<16x32xf32>
    %256 = tpu.matmul %254, %255, %cst_118 {dimension_numbers = #tpu.dot_dimension_numbers<[1], [0], [0], [1], [0, 0, 1, 1], [], []>} : vector<16x8xf32>, vector<8x32xf32>, vector<16x32xf32> -> vector<16x32xf32>
    %257 = arith.addf %237, %256 : vector<16x32xf32>
    %258 = vector.extract_strided_slice %192 {offsets = [0, 0, 24], sizes = [2, 8, 8], strides = [1, 1, 1]} : vector<2x8x32xf32> to vector<2x8x8xf32>
    %259 = vector.extract_strided_slice %193 {offsets = [0, 0, 24], sizes = [2, 8, 8], strides = [1, 1, 1]} : vector<2x8x32xf32> to vector<2x8x8xf32>
    %260 = vector.extract_strided_slice %194 {offsets = [0, 0, 24], sizes = [2, 8, 8], strides = [1, 1, 1]} : vector<2x8x32xf32> to vector<2x8x8xf32>
    "tpu.trace_start"() <{level = 10 : i32, message = "bqd,bkd->bqk"}> : () -> ()
    %cst_119 = arith.constant dense<0.000000e+00> : vector<2x8x8xf32>
    %261 = tpu.matmul %258, %259, %cst_119 {dimension_numbers = #tpu.dot_dimension_numbers<[2], [2], [1], [1], [0, 0, 0, 1, 1, 1], [0], [0]>} : vector<2x8x8xf32>, vector<2x8x8xf32>, vector<2x8x8xf32> -> vector<2x8x8xf32>
    "tpu.trace_stop"() : () -> ()
    %cst_120 = arith.constant 0.353553385 : f32
    %262 = vector.broadcast %cst_120 : f32 to vector<2x8x8xf32>
    %263 = arith.mulf %261, %262 : vector<2x8x8xf32>
    %cst_121 = arith.constant dense<0xFF800000> : vector<2x8xf32>
    %264 = vector.multi_reduction <maximumf>, %263, %cst_121 [2] : vector<2x8x8xf32> to vector<2x8xf32>
    %265 = vector.shape_cast %264 : vector<2x8xf32> to vector<2x8x1xf32>
    %266 = vector.broadcast %265 : vector<2x8x1xf32> to vector<2x8x8xf32>
    %267 = arith.subf %263, %266 : vector<2x8x8xf32>
    %268 = math.exp %267 : vector<2x8x8xf32>
    %cst_122 = arith.constant dense<0.000000e+00> : vector<2x8xf32>
    %269 = vector.multi_reduction <add>, %268, %cst_122 [2] : vector<2x8x8xf32> to vector<2x8xf32>
    %270 = vector.shape_cast %269 : vector<2x8xf32> to vector<2x8x1xf32>
    %271 = vector.broadcast %270 : vector<2x8x1xf32> to vector<2x8x8xf32>
    %272 = arith.divf %268, %271 : vector<2x8x8xf32>
    "tpu.trace_start"() <{level = 10 : i32, message = "bqk,bkd->bqd"}> : () -> ()
    %cst_123 = arith.constant dense<0.000000e+00> : vector<2x8x8xf32>
    %273 = tpu.matmul %272, %260, %cst_123 {dimension_numbers = #tpu.dot_dimension_numbers<[2], [1], [1], [2], [0, 0, 0, 1, 1, 2], [0], [0]>} : vector<2x8x8xf32>, vector<2x8x8xf32>, vector<2x8x8xf32> -> vector<2x8x8xf32>
    "tpu.trace_stop"() : () -> ()
    %274 = vector.shape_cast %273 : vector<2x8x8xf32> to vector<16x8xf32>
    %275 = vector.extract_strided_slice %196 {offsets = [24, 0], sizes = [8, 32], strides = [1, 1]} : vector<32x32xf32> to vector<8x32xf32>
    %cst_124 = arith.constant dense<0.000000e+00> : vector<16x32xf32>
    %276 = tpu.matmul %274, %275, %cst_124 {dimension_numbers = #tpu.dot_dimension_numbers<[1], [0], [0], [1], [0, 0, 1, 1], [], []>} : vector<16x8xf32>, vector<8x32xf32>, vector<16x32xf32> -> vector<16x32xf32>
    %277 = arith.addf %257, %276 : vector<16x32xf32>
    %c1_125 = arith.constant 1 : index
    %c0_126 = arith.constant 0 : index
    %c0_127 = arith.constant 0 : index
    %278 = vector.load %arg7[%c1_125, %c0_126, %c0_127] : memref<2x1x32xf32, #tpu.memory_space<vmem>>, vector<1x1x32xf32>
    %279 = vector.shape_cast %278 : vector<1x1x32xf32> to vector<1x32xf32>
    %280 = vector.broadcast %279 : vector<1x32xf32> to vector<16x32xf32>
    %281 = arith.addf %277, %280 : vector<16x32xf32>
    %282 = arith.addf %174, %281 : vector<16x32xf32>
    %c1_128 = arith.constant 1 : index
    %c0_129 = arith.constant 0 : index
    %c0_130 = arith.constant 0 : index
    %283 = vector.load %arg8[%c1_128, %c0_129, %c0_130] : memref<2x1x32xf32, #tpu.memory_space<vmem>>, vector<1x1x32xf32>
    %284 = vector.shape_cast %283 : vector<1x1x32xf32> to vector<1x32xf32>
    %c1_131 = arith.constant 1 : index
    %c0_132 = arith.constant 0 : index
    %c0_133 = arith.constant 0 : index
    %285 = vector.load %arg9[%c1_131, %c0_132, %c0_133] : memref<2x1x32xf32, #tpu.memory_space<vmem>>, vector<1x1x32xf32>
    %286 = vector.shape_cast %285 : vector<1x1x32xf32> to vector<1x32xf32>
    %cst_134 = arith.constant dense<0.000000e+00> : vector<16xf32>
    %287 = vector.multi_reduction <add>, %282, %cst_134 [1] : vector<16x32xf32> to vector<16xf32>
    %288 = vector.shape_cast %287 : vector<16xf32> to vector<16x1xf32>
    %cst_135 = arith.constant 3.200000e+01 : f32
    %289 = vector.broadcast %cst_135 : f32 to vector<16x1xf32>
    %290 = arith.divf %288, %289 : vector<16x1xf32>
    %291 = vector.broadcast %290 : vector<16x1xf32> to vector<16x32xf32>
    %292 = arith.subf %282, %291 : vector<16x32xf32>
    %293 = arith.mulf %292, %292 : vector<16x32xf32>
    %cst_136 = arith.constant dense<0.000000e+00> : vector<16xf32>
    %294 = vector.multi_reduction <add>, %293, %cst_136 [1] : vector<16x32xf32> to vector<16xf32>
    %295 = vector.shape_cast %294 : vector<16xf32> to vector<16x1xf32>
    %cst_137 = arith.constant 3.200000e+01 : f32
    %296 = vector.broadcast %cst_137 : f32 to vector<16x1xf32>
    %297 = arith.divf %295, %296 : vector<16x1xf32>
    %cst_138 = arith.constant 9.99999974E-6 : f32
    %298 = vector.broadcast %cst_138 : f32 to vector<16x1xf32>
    %299 = arith.addf %297, %298 : vector<16x1xf32>
    %300 = math.rsqrt %299 : vector<16x1xf32>
    %301 = vector.broadcast %300 : vector<16x1xf32> to vector<16x32xf32>
    %302 = arith.mulf %292, %301 : vector<16x32xf32>
    %303 = vector.broadcast %284 : vector<1x32xf32> to vector<16x32xf32>
    %304 = arith.mulf %302, %303 : vector<16x32xf32>
    %305 = vector.broadcast %286 : vector<1x32xf32> to vector<16x32xf32>
    %306 = arith.addf %304, %305 : vector<16x32xf32>
    %c1_139 = arith.constant 1 : index
    %c0_140 = arith.constant 0 : index
    %c0_141 = arith.constant 0 : index
    %307 = vector.load %arg10[%c1_139, %c0_140, %c0_141] : memref<2x32x64xf32, #tpu.memory_space<vmem>>, vector<1x32x64xf32>
    %308 = vector.shape_cast %307 : vector<1x32x64xf32> to vector<32x64xf32>
    %cst_142 = arith.constant dense<0.000000e+00> : vector<16x64xf32>
    %309 = tpu.matmul %306, %308, %cst_142 {dimension_numbers = #tpu.dot_dimension_numbers<[1], [0], [0], [1], [0, 0, 1, 1], [], []>} : vector<16x32xf32>, vector<32x64xf32>, vector<16x64xf32> -> vector<16x64xf32>
    %c1_143 = arith.constant 1 : index
    %c0_144 = arith.constant 0 : index
    %c0_145 = arith.constant 0 : index
    %310 = vector.load %arg11[%c1_143, %c0_144, %c0_145] : memref<2x1x64xf32, #tpu.memory_space<vmem>>, vector<1x1x64xf32>
    %311 = vector.shape_cast %310 : vector<1x1x64xf32> to vector<1x64xf32>
    %312 = vector.broadcast %311 : vector<1x64xf32> to vector<16x64xf32>
    %313 = arith.addf %309, %312 : vector<16x64xf32>
    %cst_146 = arith.constant 0.000000e+00 : f32
    %314 = vector.broadcast %cst_146 : f32 to vector<16x64xf32>
    %315 = arith.maximumf %313, %314 : vector<16x64xf32>
    %c1_147 = arith.constant 1 : index
    %c0_148 = arith.constant 0 : index
    %c0_149 = arith.constant 0 : index
    %316 = vector.load %arg12[%c1_147, %c0_148, %c0_149] : memref<2x64x32xf32, #tpu.memory_space<vmem>>, vector<1x64x32xf32>
    %317 = vector.shape_cast %316 : vector<1x64x32xf32> to vector<64x32xf32>
    %cst_150 = arith.constant dense<0.000000e+00> : vector<16x32xf32>
    %318 = tpu.matmul %315, %317, %cst_150 {dimension_numbers = #tpu.dot_dimension_numbers<[1], [0], [0], [1], [0, 0, 1, 1], [], []>} : vector<16x64xf32>, vector<64x32xf32>, vector<16x32xf32> -> vector<16x32xf32>
    %c1_151 = arith.constant 1 : index
    %c0_152 = arith.constant 0 : index
    %c0_153 = arith.constant 0 : index
    %319 = vector.load %arg13[%c1_151, %c0_152, %c0_153] : memref<2x1x32xf32, #tpu.memory_space<vmem>>, vector<1x1x32xf32>
    %320 = vector.shape_cast %319 : vector<1x1x32xf32> to vector<1x32xf32>
    %321 = vector.broadcast %320 : vector<1x32xf32> to vector<16x32xf32>
    %322 = arith.addf %318, %321 : vector<16x32xf32>
    %323 = arith.addf %306, %322 : vector<16x32xf32>
    %c1_154 = arith.constant 1 : index
    %c0_155 = arith.constant 0 : index
    %c0_156 = arith.constant 0 : index
    %324 = vector.load %arg14[%c1_154, %c0_155, %c0_156] : memref<2x1x32xf32, #tpu.memory_space<vmem>>, vector<1x1x32xf32>
    %325 = vector.shape_cast %324 : vector<1x1x32xf32> to vector<1x32xf32>
    %c1_157 = arith.constant 1 : index
    %c0_158 = arith.constant 0 : index
    %c0_159 = arith.constant 0 : index
    %326 = vector.load %arg15[%c1_157, %c0_158, %c0_159] : memref<2x1x32xf32, #tpu.memory_space<vmem>>, vector<1x1x32xf32>
    %327 = vector.shape_cast %326 : vector<1x1x32xf32> to vector<1x32xf32>
    %cst_160 = arith.constant dense<0.000000e+00> : vector<16xf32>
    %328 = vector.multi_reduction <add>, %323, %cst_160 [1] : vector<16x32xf32> to vector<16xf32>
    %329 = vector.shape_cast %328 : vector<16xf32> to vector<16x1xf32>
    %cst_161 = arith.constant 3.200000e+01 : f32
    %330 = vector.broadcast %cst_161 : f32 to vector<16x1xf32>
    %331 = arith.divf %329, %330 : vector<16x1xf32>
    %332 = vector.broadcast %331 : vector<16x1xf32> to vector<16x32xf32>
    %333 = arith.subf %323, %332 : vector<16x32xf32>
    %334 = arith.mulf %333, %333 : vector<16x32xf32>
    %cst_162 = arith.constant dense<0.000000e+00> : vector<16xf32>
    %335 = vector.multi_reduction <add>, %334, %cst_162 [1] : vector<16x32xf32> to vector<16xf32>
    %336 = vector.shape_cast %335 : vector<16xf32> to vector<16x1xf32>
    %cst_163 = arith.constant 3.200000e+01 : f32
    %337 = vector.broadcast %cst_163 : f32 to vector<16x1xf32>
    %338 = arith.divf %336, %337 : vector<16x1xf32>
    %cst_164 = arith.constant 9.99999974E-6 : f32
    %339 = vector.broadcast %cst_164 : f32 to vector<16x1xf32>
    %340 = arith.addf %338, %339 : vector<16x1xf32>
    %341 = math.rsqrt %340 : vector<16x1xf32>
    %342 = vector.broadcast %341 : vector<16x1xf32> to vector<16x32xf32>
    %343 = arith.mulf %333, %342 : vector<16x32xf32>
    %344 = vector.broadcast %325 : vector<1x32xf32> to vector<16x32xf32>
    %345 = arith.mulf %343, %344 : vector<16x32xf32>
    %346 = vector.broadcast %327 : vector<1x32xf32> to vector<16x32xf32>
    %347 = arith.addf %345, %346 : vector<16x32xf32>
    %c0_165 = arith.constant 0 : index
    %c0_166 = arith.constant 0 : index
    %348 = vector.load %arg16[%c0_165, %c0_166] : memref<16x32xf32, #tpu.memory_space<vmem>>, vector<16x32xf32>
    tpu.vector_store %arg16[%c0_165, %c0_166], %347 {strides = array<i32>} : memref<16x32xf32, #tpu.memory_space<vmem>>, vector<16x32xf32>,
    return
  }
}

</mosaic_0001>

<bundles_post_ra>
// kernel: _encoder_pallas.1
= control target key start
LH: loop header
LB: loop body
LE: loop exit
PB: predicated region body
PF: predicated region fallthrough
CT: control target
= control target key end

     0   :  { %s3265_s0 = inlined_call_operand.hbm [shape: f32[16,32], index: 0, kind: input, shape index: {}]   ;;  %s3266_s1 = inlined_call_operand.hbm [shape: f32[16,32], index: 1, kind: input, shape index: {}]   ;;  %s3267_s2 = inlined_call_operand.vmem [shape: f32[2,32,64], index: 2, kind: input, shape index: {}]   ;;  %s3268_s3 = inlined_call_operand.vmem [shape: f32[2,1,64], index: 3, kind: input, shape index: {}]   ;;  %s3269_s4 = inlined_call_operand.vmem [shape: f32[2,32,32], index: 4, kind: input, shape index: {}]   ;;  %s3270_s5 = inlined_call_operand.hbm [shape: f32[2,1,32], index: 5, kind: input, shape index: {}]   ;;  %s3271_s6 = inlined_call_operand.vmem [shape: f32[2,32,32], index: 6, kind: input, shape index: {}]   ;;  %s3272_s7 = inlined_call_operand.vmem [shape: f32[2,1,32], index: 7, kind: input, shape index: {}]   ;;  %s3273_s8 = inlined_call_operand.hbm [shape: f32[2,1,32], index: 8, kind: input, shape index: {}]   ;;  %s3274_s9 = inlined_call_operand.vmem [shape: f32[2,1,32], index: 9, kind: input, shape index: {}]   ;;  %s3275_s10 = inlined_call_operand.hbm [shape: f32[2,32,64], index: 10, kind: input, shape index: {}]   ;;  %s3276_s11 = inlined_call_operand.vmem [shape: f32[2,1,64], index: 11, kind: input, shape index: {}]   ;;  %s3277_s12 = inlined_call_operand.vmem [shape: f32[2,64,32], index: 12, kind: input, shape index: {}]   ;;  %s3278_s13 = inlined_call_operand.vmem [shape: f32[2,1,32], index: 13, kind: input, shape index: {}]   ;;  %s3279_s14 = inlined_call_operand.hbm [shape: f32[2,1,32], index: 14, kind: input, shape index: {}]   ;;  %s3280_s15 = inlined_call_operand.vmem [shape: f32[2,1,32], index: 15, kind: input, shape index: {}]   ;;  %s3281_s16 = inlined_call_operand.hbm [shape: f32[16,32], index: 16, kind: output, shape index: {}]  }
   0x1   :  { %3284 = sst [smem:[#allocation19_spill]] %s3265_s0 }
   0x2   :  { %3285 = sst [smem:[#allocation20_spill]] %s3281_s16 }
   0x3   :  { %21 = vsyncpa [#allocation3], 0 }
   0x4   :  { %22 = vsyncpa [#allocation6], 0 }
   0x5   :  { %23 = vsyncpa [#allocation9], 0 }
   0x6   :  { %24 = vsyncpa [#allocation12], 0 }
   0x7   :  { %25 = vsyncpa [#allocation4], 0  ;;  %s43_s23 = sshll.u32 %s3266_s1, 4  ;;  %s2671_s24 = smov [#allocation5]   ;;  %s44_s23 = int_to_ptr.hbm [resolvable:$true] %s43_s23 }
   0x8   :  { %s45_s25 = sshll.u32 %s2671_s24, 4  ;;  %s3282_s26 = smov 128   ;;  %s46_s25 = int_to_ptr.vmem [resolvable:$true] %s45_s25 }
   0x9   :  { %s2673_s27 = smov 8   ;;  %s79_s30 = sshll.u32 %s3273_s8, 4  ;;  %s80_s30 = int_to_ptr.hbm [resolvable:$true] %s79_s30 }
   0xa   :  { %51 = dma.hbm_to_vmem [thread:$0]  %s44_s23, 256, %s46_s25, [#allocation6], %s3282_s26, %s3282_s26, %s2673_s27  }
   0xb   :  { %s2674_s0 = smov [#allocation8]   ;;  %s3286_s1 = sld [smem:[#allocation19_spill]] }
   0xc   :  { %s81_s17 = sshll.u32 %s2674_s0, 4  ;;  %s2675_s21 = smov 16   ;;  %s82_s17 = int_to_ptr.vmem [resolvable:$true] %s81_s17 }
   0xd   :  { %s2676_s22 = smov 1   ;;  %s62_s23 = sshll.u32 %s3270_s5, 4  ;;  %s63_s23 = int_to_ptr.hbm [resolvable:$true] %s62_s23 }
   0xe   :  { %87 = dma.hbm_to_vmem [thread:$0]  %s80_s30, 32, %s82_s17, [#allocation9], %s2675_s21, %s2675_s21, %s2676_s22  }
   0xf   :  { %s2677_s25 = smov [#allocation2]   ;;  %s3287_s8 = smov 128  }
  0x10   :  { %s32_s26 = sshll.u32 %s2677_s25, 4  ;;  %s2678_s28 = smov [#allocation7]   ;;  %s33_s26 = int_to_ptr.vmem [resolvable:$true] %s32_s26 }
  0x11   :  { %s30_s20 = sshll.u32 %s3286_s1, 4  ;;  %s64_s29 = sshll.u32 %s2678_s28, 4  ;;  %s31_s20 = int_to_ptr.hbm [resolvable:$true] %s30_s20  ;;  %s65_s29 = int_to_ptr.vmem [resolvable:$true] %s64_s29 }
  0x12   :  { %38 = dma.hbm_to_vmem [thread:$0]  %s31_s20, 256, %s33_s26, [#allocation3], %s3287_s8, %s3287_s8, %s2673_s27  }
  0x13   :  { %s94_s19 = sshll.u32 %s3275_s10, 4  ;;  %s113_s5 = sshll.u32 %s3279_s14, 4  ;;  %s95_s19 = int_to_ptr.hbm [resolvable:$true] %s94_s19  ;;  %s114_s5 = int_to_ptr.hbm [resolvable:$true] %s113_s5 }
  0x14   :  { %70 = dma.hbm_to_vmem [thread:$0]  %s63_s23, 32, %s65_s29, [#allocation6], %s2675_s21, %s2675_s21, %s2676_s22  }
  0x15   :  { %s2679_s17 = smov [#allocation10]   ;;  %s2680_s26 = smov [#allocation11]  }
  0x16   :  { %s96_s1 = sshll.u32 %s2679_s17, 4  ;;  %s115_s20 = sshll.u32 %s2680_s26, 4  ;;  %s97_s1 = int_to_ptr.vmem [resolvable:$true] %s96_s1  ;;  %s116_s20 = int_to_ptr.vmem [resolvable:$true] %s115_s20 }
  0x17   :  { %102 = dma.hbm_to_vmem [thread:$0]  %s95_s19, 1024, %s97_s1, [#allocation9], %s3287_s8, %s3287_s8, %s2673_s27  }
  0x18   :  { %121 = dma.hbm_to_vmem [thread:$0]  %s114_s5, 32, %s116_s20, [#allocation12], %s2675_s21, %s2675_s21, %s2676_s22  }
  0x19   :  { %2661 = dma.done.wait [#allocation3], 256  }
  0x1a   :  { %2662 = vsyncadd [#allocation3], 4294967040 }
  0x1b   :  { %2663 = dma.done.wait [#allocation6], 288  }
  0x1c   :  { %2664 = vsyncadd [#allocation6], 4294967008 }
  0x1d   :  { %2665 = dma.done.wait [#allocation9], 1056  }
  0x1e   :  { %2666 = vsyncadd [#allocation9], 4294966240 }
  0x1f   :  { %2667 = dma.done.wait [#allocation12], 32  }
  0x20   :  { %2668 = vsyncadd [#allocation12], 4294967264  ;;  %v157_v0 = vld [vmem:[%s3267_s2 + $0x18] sm:$0xff]  ;;  %v156_v1 = vld [vmem:[%s3267_s2 + $0x10] sm:$0xff]  ;;  %vm162_vm0 = vcmask 261120   ;;  %s2681_s20 = smov 88  }
  0x21   :  { %181 = vmatpush.msra.mxu0 %v157_v0  ;;  %v2808_v2 = vld [vmem:[#allocation2] sm:$0xff]  ;;  %v150_v3 = vld [vmem:[#allocation5] sm:$0xff]  ;;  %v155_v4 = vld [vmem:[%s3267_s2 + $0x8] sm:$0xff]  ;;  %s2682_s10 = smov 96   ;;  %s2683_s14 = smov 120   ;;  %vm236_vm1 = vcmask 64512  }
  0x22   :  { %v195_v5 = vld [vmem:[%s3269_s4 + $0x18] sm:$0xff]  ;;  %v194_v6 = vld [vmem:[%s3269_s4 + $0x10] sm:$0xff]  ;;  %v154_v7 = vld [vmem:[%s3267_s2] sm:$0xff]  ;;  %v152_v9 = vadd.f32 %v150_v3, %v2808_v2  ;;  %s2684_s24 = smov 80   ;;  %s2685_s23 = smov 112  }
  0x23   :  { %182 = vmatpush.msra.mxu0 %v156_v1  ;;  %218 = vmatpush.msra.mxu1 %v195_v5  ;;  %v193_v8 = vld [vmem:[%s3269_s4 + $0x8] sm:$0xff]  ;;  %v192_v10 = vld [vmem:[%s3269_s4] sm:$0xff]  ;;  %v151_v20 = vld [vmem:[#allocation5 + $0x8] sm:$0xff]  ;;  %s2686_s29 = smov 104   ;;  %s2687_s0 = smov 72  }
  0x24   :  { %v2391_v11 = vld [vmem:[%s3268_s3] ss:$0 sm:$0xff]  ;;  %v2850_v19 = vld [vmem:[#allocation2 + $0x8] sm:$0xff] }
  0x25   :  { %183 = vmatpush.msra.mxu0 %v155_v4  ;;  %219 = vmatpush.msra.mxu1 %v194_v6  ;;  %v2392_v12 = vld [vmem:[#allocation7] ss:$0 sm:$0xff]  ;;  %v153_v21 = vadd.f32 %v151_v20, %v2850_v19 }
  0x27   :  { %184 = vmatpush.msra.mxu0 %v154_v7  ;;  %220 = vmatpush.msra.mxu1 %v193_v8 }
  0x28   :  { %2256 = vmatmul.msk.f32.vlgmr.msra.gmra.mxu0 %vm162_vm0, %v152_v9 }
  0x29   :  { %221 = vmatpush.msra.mxu1 %v192_v10 }
  0x2a   :  { %2258 = vmatmul.msk.f32.vlgmr.msra.gmra.mxu1 %vm162_vm0, %v2808_v2 }
  0x30   :  { %2257 = vmatmul.msk.f32.gmra.mxu0 %vm162_vm0, %v153_v21 }
  0x32   :  { %2259 = vmatmul.msk.f32.gmra.mxu1 %vm162_vm0, %v2850_v19 }
  0xa5   :  { %v186_v13 = vpop.f32.mrf.mxu0 }
  0xa6   :  { %v2835_v14 = vadd.f32 %v2391_v11, %v186_v13 }
  0xa7   :  { %v223_v15 = vpop.f32.mrf.mxu1 }
  0xa8   :  { %386 = vrot.lane.b32.xlu2 %v2835_v14, %s2681_s20  ;;  %234 = vrot.lane.b32.xlu0 %v2835_v14, %s2682_s10  ;;  %v2841_v16 = vadd.f32 %v2392_v12, %v223_v15 }
  0xaa   :  { %356 = vmatpush.msra.mxu2 %v2841_v16 }
  0xad   :  { %v189_v30 = vpop.f32.mrf.mxu0 }
  0xae   :  { %v2858_v31 = vadd.f32 %v2391_v11, %v189_v30 }
  0xaf   :  { %v226_v44 = vpop.f32.mrf.mxu1 }
  0xb0   :  { %384 = vrot.lane.b32.xlu2 %v2835_v14, %s2683_s14  ;;  %v2863_v46 = vadd.f32 %v2392_v12, %v226_v44 }
 0x102   :  { %v387_v17 = vpop.permute.xlu2 %386 }
 0x103   :  { %2266 = vmatpush.xpose.msk.msrb.mxu2 %vm236_vm1, %v387_v17 }
 0x10a   :  { %v385_v47 = vpop.permute.xlu2 %384 }
 0x11a   :  { %v235_v18 = vpop.permute.xlu0 %234 }
 0x11b   :  { %2260 = vmatpush.xpose.msk.msra.mxu3 %vm236_vm1, %v235_v18 }
 0x11e   :  { %2261 = vmatmul.msk.f32.vlgmr.msra.gmra.mxu3 %vm236_vm1, %v2835_v14 }
 0x1a1   :  { %v258_v22 = vpop.f32.mrf.mxu3 }
 0x1a2   :  { %v288_v23 = vmul.f32 0.35355338, %v258_v22 }
 0x1a4   :  { %v290_v24 = vsel %vm236_vm1, %v288_v23, -inf }
 0x1a5   :  { %291 = vmax.xlane.f32.xlu0 %v290_v24 }
 0x218   :  { %v292_v25 = vpop.xlane.xlu0 %291 }
 0x219   :  { %v296_v26 = vsub.f32 %v288_v23, %v292_v25 }
 0x21b   :  { %v298_v27 = vmul.f32 1.442695, %v296_v26 }
 0x21d   :  { %2409 = vpow2.f32 %v298_v27 }
 0x223   :  { %v2410_v28 = vpop.eup %2409 }
 0x224   :  { %v302_v29 = vsel %vm236_vm1, %v2410_v28, 0.0 }
 0x225   :  { %303 = vadd.xlane.f32.xlu1 %v302_v29 }
 0x23e   :  { %262 = vrot.lane.b32.xlu1 %v2858_v31, %s2682_s10 }
 0x298   :  { %v304_v32 = vpop.xlane.xlu1 %303 }
 0x299   :  { %2411 = vrcp.f32 %v304_v32  ;;  %v319_v36 = vand.u32 2147483648, %v304_v32  ;;  %v317_v38 = vand.u32 2147483647, %v304_v32  ;;  %vm313_vm3 = vweird.f32 %v304_v32 }
 0x29b   :  { %v320_v40 = vor.u32 1.1754944e-38, %v319_v36  ;;  %vm318_vm5 = vcmp.eq.f32.partialorder %v317_v38, 8.507059e+37  ;;  %v230_v36 = vld [vmem:[%s3271_s6 + $0x8] sm:$0xff] }
 0x29f   :  { %v2412_v33 = vpop.eup %2411 }
 0x2a0   :  { %v309_v34 = vmul.f32 %v2412_v33, %v304_v32  ;;  %vm314_vm2 = vweird.f32 %v2412_v33  ;;  %v229_v32 = vld [vmem:[%s3271_s6] sm:$0xff] }
 0x2a1   :  { %vm315_vm4 = vmor %vm313_vm3, %vm314_vm2 }
 0x2a2   :  { %v310_v35 = vsub.f32 1.0, %v309_v34 }
 0x2a4   :  { %v311_v37 = vmul.f32 %v2412_v33, %v310_v35 }
 0x2a6   :  { %v312_v39 = vadd.f32 %v2412_v33, %v311_v37 }
 0x2a8   :  { %v316_v41 = vsel %vm315_vm4, %v2412_v33, %v312_v39 }
 0x2a9   :  { %v321_v42 = vsel %vm318_vm5, %v320_v40, %v316_v41 }
 0x2aa   :  { %v322_v43 = vmul.f32 %v2410_v28, %v321_v42 }
 0x2ac   :  { %2264 = vmatmul.msk.f32.vlgmr.msra.gmra.mxu2 %vm236_vm1, %v322_v43 }
 0x2ad   :  { %565 = vmatpush.msra.mxu2 %v230_v36 }
 0x2b0   :  { %v263_v45 = vpop.permute.xlu1 %262 }
 0x2b1   :  { %2262 = vmatpush.xpose.msk.msrb.mxu3 %vm236_vm1, %v263_v45 }
 0x2b4   :  { %2263 = vmatmul.msk.f32.vlgmr.msrb.gmra.mxu3 %vm236_vm1, %v2858_v31  ;;  %2267 = vmatmul.msk.f32.vlgmr.msrb.gmra.mxu2 %vm236_vm1, %v385_v47 }
 0x2b5   :  { %379 = vmatpush.msra.mxu3 %v2863_v46 }
 0x32f   :  { %v2870_v48 = vpop.f32.mrf.mxu2 }
 0x337   :  { %v285_v49 = vpop.f32.mrf.mxu3  ;;  %v409_v50 = vpop.f32.mrf.mxu2 }
 0x338   :  { %v289_v51 = vmul.f32 0.35355338, %v285_v49  ;;  %v440_v52 = vmul.f32 0.35355338, %v409_v50 }
 0x33a   :  { %v442_v53 = vsel %vm236_vm1, %v440_v52, -inf  ;;  %v293_v54 = vsel %vm236_vm1, %v289_v51, -inf }
 0x33b   :  { %443 = vmax.xlane.f32.xlu1 %v442_v53  ;;  %294 = vmax.xlane.f32.xlu2 %v293_v54 }
 0x354   :  { %491 = vrot.lane.b32.xlu1 %v2841_v16, %s2683_s14 }
 0x3ae   :  { %v295_v55 = vpop.xlane.xlu2 %294  ;;  %v444_v56 = vpop.xlane.xlu1 %443 }
 0x3af   :  { %v297_v57 = vsub.f32 %v289_v51, %v295_v55  ;;  %v448_v58 = vsub.f32 %v440_v52, %v444_v56 }
 0x3b1   :  { %v300_v59 = vmul.f32 1.442695, %v297_v57  ;;  %v450_v60 = vmul.f32 1.442695, %v448_v58 }
 0x3b3   :  { %2413 = vpow2.f32 %v300_v59 }
 0x3b4   :  { %2415 = vpow2.f32 %v450_v60 }
 0x3b9   :  { %v2414_v61 = vpop.eup %2413 }
 0x3ba   :  { %v2416_v62 = vpop.eup %2415  ;;  %v305_v63 = vsel %vm236_vm1, %v2414_v61, 0.0 }
 0x3bb   :  { %306 = vadd.xlane.f32.xlu0 %v305_v63  ;;  %v454_v0 = vsel %vm236_vm1, %v2416_v62, 0.0 }
 0x3bc   :  { %455 = vadd.xlane.f32.xlu2 %v454_v0 }
 0x3c6   :  { %v492_v1 = vpop.permute.xlu1 %491 }
 0x3c7   :  { %512 = vmatpush.msrb.mxu0 %v492_v1 }
 0x3cf   :  { %414 = vrot.lane.b32.xlu0 %v2858_v31, %s2681_s20 }
 0x3d4   :  { %412 = vrot.lane.b32.xlu2 %v2858_v31, %s2683_s14 }
 0x3d7   :  { %604 = vrot.lane.b32.xlu0 %v2835_v14, %s2684_s24 }
 0x3df   :  { %602 = vrot.lane.b32.xlu0 %v2835_v14, %s2685_s23 }
 0x42e   :  { %v307_v3 = vpop.xlane.xlu0 %306 }
 0x42f   :  { %2417 = vrcp.f32 %v307_v3  ;;  %v456_v4 = vpop.xlane.xlu2 %455  ;;  %v334_v10 = vand.u32 2147483648, %v307_v3  ;;  %v332_v13 = vand.u32 2147483647, %v307_v3  ;;  %vm328_vm8 = vweird.f32 %v307_v3 }
 0x430   :  { %2419 = vrcp.f32 %v456_v4  ;;  %v471_v15 = vand.u32 2147483648, %v456_v4  ;;  %v469_v18 = vand.u32 2147483647, %v456_v4  ;;  %vm465_vm10 = vweird.f32 %v456_v4 }
 0x431   :  { %v335_v21 = vor.u32 1.1754944e-38, %v334_v10  ;;  %vm333_vm11 = vcmp.eq.f32.partialorder %v332_v13, 8.507059e+37 }
 0x432   :  { %v472_v24 = vor.u32 1.1754944e-38, %v471_v15  ;;  %vm470_vm13 = vcmp.eq.f32.partialorder %v469_v18, 8.507059e+37 }
 0x435   :  { %v2418_v5 = vpop.eup %2417 }
 0x436   :  { %v2420_v6 = vpop.eup %2419  ;;  %v324_v7 = vmul.f32 %v2418_v5, %v307_v3  ;;  %vm329_vm6 = vweird.f32 %v2418_v5 }
 0x437   :  { %v461_v8 = vmul.f32 %v2420_v6, %v456_v4  ;;  %vm466_vm7 = vweird.f32 %v2420_v6  ;;  %vm330_vm9 = vmor %vm328_vm8, %vm329_vm6  ;;  %v413_v33 = vpop.permute.xlu2 %412 }
 0x438   :  { %v325_v9 = vsub.f32 1.0, %v324_v7  ;;  %vm467_vm12 = vmor %vm465_vm10, %vm466_vm7 }
 0x439   :  { %v462_v11 = vsub.f32 1.0, %v461_v8 }
 0x43a   :  { %v326_v12 = vmul.f32 %v2418_v5, %v325_v9 }
 0x43b   :  { %v463_v17 = vmul.f32 %v2420_v6, %v462_v11 }
 0x43c   :  { %v327_v20 = vadd.f32 %v2418_v5, %v326_v12 }
 0x43d   :  { %v464_v22 = vadd.f32 %v2420_v6, %v463_v17 }
 0x43e   :  { %v331_v23 = vsel %vm330_vm9, %v2418_v5, %v327_v20 }
 0x43f   :  { %v336_v25 = vsel %vm333_vm11, %v335_v21, %v331_v23  ;;  %v468_v26 = vsel %vm467_vm12, %v2420_v6, %v464_v22 }
 0x440   :  { %v337_v27 = vmul.f32 %v2414_v61, %v336_v25  ;;  %v473_v28 = vsel %vm470_vm13, %v472_v24, %v468_v26  ;;  %v231_v26 = vld [vmem:[%s3271_s6 + $0x10] sm:$0xff] }
 0x441   :  { %v415_v29 = vpop.permute.xlu0 %414  ;;  %v474_v30 = vmul.f32 %v2416_v62, %v473_v28  ;;  %781 = vmatpush.msrb.mxu2 %v231_v26 }
 0x442   :  { %2265 = vmatmul.msk.f32.vlgmr.msra.gmra.mxu3 %vm236_vm1, %v337_v27 }
 0x443   :  { %2268 = vmatpush.xpose.msk.msrb.mxu3 %vm236_vm1, %v415_v29  ;;  %2270 = vmatmul.msk.f32.vlgmr.msrb.gmra.mxu0 %vm236_vm1, %v474_v30 }
 0x447   :  { %594 = vmatpush.msra.mxu3 %v229_v32 }
 0x449   :  { %v605_v34 = vpop.permute.xlu0 %604 }
 0x44a   :  { %2269 = vmatmul.msk.f32.vlgmr.msrb.gmra.mxu3 %vm236_vm1, %v413_v33  ;;  %2276 = vmatpush.xpose.msk.msra.mxu0 %vm236_vm1, %v605_v34 }
 0x451   :  { %v603_v35 = vpop.permute.xlu0 %602 }
 0x452   :  { %2274 = vmatmul.msk.f32.vlgmr.msra.gmra.mxu3 %vm236_vm1, %v2870_v48  ;;  %2277 = vmatmul.msk.f32.vlgmr.msra.gmra.mxu0 %vm236_vm1, %v603_v35 }
 0x4c0   :  { %v514_v37 = vpop.f32.mrf.mxu0 }
 0x4c1   :  { %2272 = vmatmul.msk.f32.vlgmr.msra.gmra.mxu2 %vm236_vm1, %v514_v37 }
 0x4c5   :  { %v381_v38 = vpop.f32.mrf.mxu3 }
 0x4c6   :  { %2275 = vmatmul.msk.f32.gmra.mxu3 %vm236_vm1, %v381_v38 }
 0x4cd   :  { %v437_v39 = vpop.f32.mrf.mxu3 }
 0x4ce   :  { %v441_v40 = vmul.f32 0.35355338, %v437_v39 }
 0x4cf   :  { %v627_v41 = vpop.f32.mrf.mxu0 }
 0x4d0   :  { %v658_v42 = vmul.f32 0.35355338, %v627_v41  ;;  %v445_v43 = vsel %vm236_vm1, %v441_v40, -inf }
 0x4d1   :  { %446 = vmax.xlane.f32.xlu2 %v445_v43 }
 0x4d2   :  { %v660_v44 = vsel %vm236_vm1, %v658_v42, -inf }
 0x4d3   :  { %661 = vmax.xlane.f32.xlu0 %v660_v44 }
 0x4d5   :  { %v2933_v27 = vpop.f32.mrf.mxu3 }
 0x4e7   :  { %518 = vrot.lane.b32.xlu0 %v2863_v46, %s2683_s14 }
 0x4e9   :  { %632 = vrot.lane.b32.xlu2 %v2858_v31, %s2684_s24 }
 0x4ef   :  { %630 = vrot.lane.b32.xlu0 %v2858_v31, %s2685_s23 }
 0x4f1   :  { %708 = vrot.lane.b32.xlu2 %v2841_v16, %s2685_s23 }
 0x4f7   :  { %791 = vrot.lane.b32.xlu0 %v2835_v14, %s2686_s29 }
 0x544   :  { %v447_v45 = vpop.xlane.xlu2 %446 }
 0x545   :  { %v449_v47 = vsub.f32 %v441_v40, %v447_v45 }
 0x546   :  { %v662_v48 = vpop.xlane.xlu0 %661 }
 0x547   :  { %v452_v49 = vmul.f32 1.442695, %v449_v47  ;;  %v666_v50 = vsub.f32 %v658_v42, %v662_v48 }
 0x549   :  { %2421 = vpow2.f32 %v452_v49  ;;  %v668_v51 = vmul.f32 1.442695, %v666_v50  ;;  %v2936_v29 = vpop.f32.mrf.mxu3 }
 0x54b   :  { %2423 = vpow2.f32 %v668_v51 }
 0x54c   :  { %v633_v52 = vpop.permute.xlu2 %632 }
 0x54f   :  { %v2422_v53 = vpop.eup %2421 }
 0x550   :  { %v457_v54 = vsel %vm236_vm1, %v2422_v53, 0.0 }
 0x551   :  { %v2424_v55 = vpop.eup %2423  ;;  %458 = vadd.xlane.f32.xlu1 %v457_v54 }
 0x552   :  { %v672_v56 = vsel %vm236_vm1, %v2424_v55, 0.0 }
 0x553   :  { %673 = vadd.xlane.f32.xlu2 %v672_v56 }
 0x554   :  { %v709_v57 = vpop.permute.xlu2 %708 }
 0x555   :  { %729 = vmatpush.msrb.mxu0 %v709_v57  ;;  %v2381_v57 = vpack.i.bf16 %v2863_v46, %v2841_v16 }
 0x559   :  { %v519_v58 = vpop.permute.xlu0 %518 }
 0x55a   :  { %539 = vmatpush.msrb.mxu1 %v519_v58 }
 0x55c   :  { %2278 = vmatpush.xpose.msk.msra.mxu1 %vm236_vm1, %v633_v52 }
 0x561   :  { %v631_v12 = vpop.permute.xlu0 %630 }
 0x569   :  { %v792_v23 = vpop.permute.xlu0 %791 }
 0x56a   :  { %793 = vrot.lane.b32.xlu1 %v2835_v14, %s2687_s0 }
 0x56b   :  { %819 = vrot.lane.b32.xlu2 %v2858_v31, %s2686_s29 }
 0x572   :  { %821 = vrot.lane.b32.xlu1 %v2858_v31, %s2687_s0 }
 0x5c4   :  { %v459_v59 = vpop.xlane.xlu1 %458 }
 0x5c5   :  { %2425 = vrcp.f32 %v459_v59  ;;  %v486_v3 = vand.u32 2147483648, %v459_v59  ;;  %v484_v5 = vand.u32 2147483647, %v459_v59  ;;  %vm480_vm15 = vweird.f32 %v459_v59 }
 0x5c6   :  { %v674_v60 = vpop.xlane.xlu2 %673 }
 0x5c7   :  { %2427 = vrcp.f32 %v674_v60  ;;  %v689_v6 = vand.u32 2147483648, %v674_v60  ;;  %v687_v31 = vand.u32 2147483647, %v674_v60  ;;  %v487_v9 = vor.u32 1.1754944e-38, %v486_v3 }
 0x5c8   :  { %vm485_vm4 = vcmp.eq.f32.partialorder %v484_v5, 8.507059e+37  ;;  %vm683_vm5 = vweird.f32 %v674_v60 }
 0x5c9   :  { %v690_v13 = vor.u32 1.1754944e-38, %v689_v6  ;;  %vm688_vm7 = vcmp.eq.f32.partialorder %v687_v31, 8.507059e+37 }
 0x5cb   :  { %v2426_v61 = vpop.eup %2425 }
 0x5cc   :  { %v476_v62 = vmul.f32 %v2426_v61, %v459_v59  ;;  %vm481_vm14 = vweird.f32 %v2426_v61 }
 0x5cd   :  { %v2428_v63 = vpop.eup %2427  ;;  %vm482_vm3 = vmor %vm480_vm15, %vm481_vm14 }
 0x5ce   :  { %v477_v0 = vsub.f32 1.0, %v476_v62  ;;  %v679_v1 = vmul.f32 %v2428_v63, %v674_v60  ;;  %vm684_vm2 = vweird.f32 %v2428_v63  ;;  %v820_v25 = vpop.permute.xlu2 %819 }
 0x5cf   :  { %vm685_vm6 = vmor %vm683_vm5, %vm684_vm2 }
 0x5d0   :  { %v478_v4 = vmul.f32 %v2426_v61, %v477_v0  ;;  %v680_v14 = vsub.f32 1.0, %v679_v1 }
 0x5d2   :  { %v479_v7 = vadd.f32 %v2426_v61, %v478_v4  ;;  %v681_v8 = vmul.f32 %v2428_v63, %v680_v14 }
 0x5d4   :  { %v682_v10 = vadd.f32 %v2428_v63, %v681_v8  ;;  %v483_v11 = vsel %vm482_vm3, %v2426_v61, %v479_v7 }
 0x5d5   :  { %v488_v15 = vsel %vm485_vm4, %v487_v9, %v483_v11 }
 0x5d6   :  { %v686_v17 = vsel %vm685_vm6, %v2428_v63, %v682_v10  ;;  %v489_v18 = vmul.f32 %v2422_v53, %v488_v15 }
 0x5d7   :  { %v691_v20 = vsel %vm688_vm7, %v690_v13, %v686_v17 }
 0x5d8   :  { %2271 = vmatmul.msk.f32.vlgmr.msrb.gmra.mxu1 %vm236_vm1, %v489_v18  ;;  %v692_v21 = vmul.f32 %v2424_v55, %v691_v20 }
 0x5da   :  { %2280 = vmatmul.msk.f32.vlgmr.msrb.gmra.mxu0 %vm236_vm1, %v692_v21 }
 0x5dc   :  { %v794_v22 = vpop.permute.xlu1 %793 }
 0x5dd   :  { %2284 = vmatpush.xpose.msk.msrb.mxu3 %vm236_vm1, %v794_v22 }
 0x5e0   :  { %2279 = vmatmul.msk.f32.vlgmr.msra.gmra.mxu1 %vm236_vm1, %v631_v12  ;;  %2285 = vmatmul.msk.f32.vlgmr.msrb.gmra.mxu3 %vm236_vm1, %v792_v23 }
 0x5e4   :  { %v822_v24 = vpop.permute.xlu1 %821 }
 0x5e5   :  { %2286 = vmatpush.xpose.msk.msra.mxu0 %vm236_vm1, %v822_v24 }
 0x5e8   :  { %2287 = vmatmul.msk.f32.vlgmr.msra.gmra.mxu0 %vm236_vm1, %v820_v25 }
 0x655   :  { %v541_v28 = vpop.f32.mrf.mxu1 }
 0x656   :  { %2273 = vmatmul.msk.f32.gmra.mxu2 %vm236_vm1, %v541_v28 }
 0x657   :  { %v731_v30 = vpop.f32.mrf.mxu0 }
 0x65d   :  { %v655_v32 = vpop.f32.mrf.mxu1 }
 0x65e   :  { %v659_v33 = vmul.f32 0.35355338, %v655_v32  ;;  %2282 = vmatmul.msk.f32.vlgmr.msrb.gmra.mxu2 %vm236_vm1, %v731_v30 }
 0x660   :  { %v663_v34 = vsel %vm236_vm1, %v659_v33, -inf }
 0x661   :  { %664 = vmax.xlane.f32.xlu0 %v663_v34 }
 0x663   :  { %v816_v35 = vpop.f32.mrf.mxu3 }
 0x664   :  { %v847_v36 = vmul.f32 0.35355338, %v816_v35 }
 0x665   :  { %v844_v37 = vpop.f32.mrf.mxu0 }
 0x666   :  { %v848_v38 = vmul.f32 0.35355338, %v844_v37  ;;  %v849_v39 = vsel %vm236_vm1, %v847_v36, -inf  ;;  %v232_v37 = vld [vmem:[%s3271_s6 + $0x18] sm:$0xff] }
 0x667   :  { %850 = vmax.xlane.f32.xlu1 %v849_v39  ;;  %970 = vmatpush.msrb.mxu0 %v232_v37 }
 0x668   :  { %v852_v40 = vsel %vm236_vm1, %v848_v38, -inf }
 0x669   :  { %853 = vmax.xlane.f32.xlu2 %v852_v40 }
 0x6d4   :  { %v665_v41 = vpop.xlane.xlu0 %664 }
 0x6d5   :  { %v667_v42 = vsub.f32 %v659_v33, %v665_v41  ;;  %v567_v41 = vpop.f32.mrf.mxu2 }
 0x6d7   :  { %v670_v43 = vmul.f32 1.442695, %v667_v42 }
 0x6d9   :  { %2429 = vpow2.f32 %v670_v43 }
 0x6da   :  { %v851_v44 = vpop.xlane.xlu1 %850 }
 0x6db   :  { %v855_v45 = vsub.f32 %v847_v36, %v851_v44  ;;  %v597_v44 = vadd.f32 %v2933_v27, %v567_v41 }
 0x6dc   :  { %v854_v47 = vpop.xlane.xlu2 %853 }
 0x6dd   :  { %v857_v48 = vmul.f32 1.442695, %v855_v45  ;;  %v856_v49 = vsub.f32 %v848_v38, %v854_v47  ;;  %v570_v42 = vpop.f32.mrf.mxu2  ;;  %v2393_v47 = vld [vmem:[%s3272_s7] ss:$0 sm:$0xff] }
 0x6df   :  { %v2430_v50 = vpop.eup %2429  ;;  %2431 = vpow2.f32 %v857_v48  ;;  %v859_v51 = vmul.f32 1.442695, %v856_v49 }
 0x6e0   :  { %v675_v52 = vsel %vm236_vm1, %v2430_v50, 0.0 }
 0x6e1   :  { %2433 = vpow2.f32 %v859_v51  ;;  %676 = vadd.xlane.f32.xlu0 %v675_v52  ;;  %v600_v52 = vadd.f32 %v2936_v29, %v570_v42 }
 0x6e5   :  { %v2943_v53 = vpop.eup %2431  ;;  %v783_v43 = vpop.f32.mrf.mxu2 }
 0x6e6   :  { %v861_v54 = vsel %vm236_vm1, %v2943_v53, 0.0  ;;  %v789_v45 = vadd.f32 %v783_v43, %v597_v44 }
 0x6e7   :  { %v2947_v55 = vpop.eup %2433  ;;  %862 = vadd.xlane.f32.xlu1 %v861_v54 }
 0x6e8   :  { %v864_v56 = vsel %vm236_vm1, %v2947_v55, 0.0 }
 0x6e9   :  { %865 = vadd.xlane.f32.xlu2 %v864_v56 }
 0x6f5   :  { %734 = vrot.lane.b32.xlu0 %v2863_v46, %s2685_s23 }
 0x700   :  { %2382 = vrot.lane.b32.xlu1 %v2381_v57, %s2686_s29 }
 0x754   :  { %v677_v58 = vpop.xlane.xlu0 %676 }
 0x755   :  { %2435 = vrcp.f32 %v677_v58  ;;  %v704_v0 = vand.u32 2147483648, %v677_v58  ;;  %v702_v3 = vand.u32 2147483647, %v677_v58  ;;  %vm698_vm9 = vweird.f32 %v677_v58 }
 0x757   :  { %v705_v46 = vor.u32 1.1754944e-38, %v704_v0  ;;  %vm703_vm11 = vcmp.eq.f32.partialorder %v702_v3, 8.507059e+37 }
 0x75a   :  { %v863_v59 = vpop.xlane.xlu1 %862 }
 0x75b   :  { %v2436_v60 = vpop.eup %2435  ;;  %2437 = vrcp.f32 %v863_v59  ;;  %vm872_vm14 = vweird.f32 %v863_v59  ;;  %v878_v18 = vand.u32 2147483648, %v863_v59  ;;  %v876_v21 = vand.u32 2147483647, %v863_v59 }
 0x75c   :  { %v694_v61 = vmul.f32 %v2436_v60, %v677_v58  ;;  %v866_v62 = vpop.xlane.xlu2 %865  ;;  %vm699_vm8 = vweird.f32 %v2436_v60 }
 0x75d   :  { %2439 = vrcp.f32 %v866_v62  ;;  %vm700_vm10 = vmor %vm698_vm9, %vm699_vm8  ;;  %v893_v20 = vand.u32 2147483648, %v866_v62  ;;  %vm887_vm2 = vweird.f32 %v866_v62  ;;  %v891_v22 = vand.u32 2147483647, %v866_v62 }
 0x75e   :  { %v695_v63 = vsub.f32 1.0, %v694_v61  ;;  %v879_v25 = vor.u32 1.1754944e-38, %v878_v18  ;;  %vm877_vm4 = vcmp.eq.f32.partialorder %v876_v21, 8.507059e+37  ;;  %v1095_v18 = vld [vmem:[%s3277_s12 + $0x28] sm:$0xff] }
 0x75f   :  { %v894_v26 = vor.u32 1.1754944e-38, %v893_v20  ;;  %vm892_vm5 = vcmp.eq.f32.partialorder %v891_v22, 8.507059e+37  ;;  %v1094_v22 = vld [vmem:[%s3277_s12 + $0x20] sm:$0xff] }
 0x760   :  { %v696_v1 = vmul.f32 %v2436_v60, %v695_v63 }
 0x761   :  { %v2438_v4 = vpop.eup %2437 }
 0x762   :  { %v697_v5 = vadd.f32 %v2436_v60, %v696_v1  ;;  %v868_v14 = vmul.f32 %v2438_v4, %v863_v59  ;;  %vm873_vm12 = vweird.f32 %v2438_v4 }
 0x763   :  { %v2440_v16 = vpop.eup %2439  ;;  %vm874_vm15 = vmor %vm872_vm14, %vm873_vm12 }
 0x764   :  { %v701_v6 = vsel %vm700_vm10, %v2436_v60, %v697_v5  ;;  %v869_v7 = vsub.f32 1.0, %v868_v14  ;;  %v883_v8 = vmul.f32 %v2440_v16, %v866_v62  ;;  %vm888_vm13 = vweird.f32 %v2440_v16 }
 0x765   :  { %v706_v31 = vsel %vm703_vm11, %v705_v46, %v701_v6  ;;  %vm889_vm3 = vmor %vm887_vm2, %vm888_vm13  ;;  %v2688_v60 = vmov 32.0   ;;  %vm1102_vm13 = vcmask 523264  }
 0x766   :  { %v870_v9 = vmul.f32 %v2438_v4, %v869_v7  ;;  %v884_v10 = vsub.f32 1.0, %v883_v8  ;;  %v707_v11 = vmul.f32 %v2430_v50, %v706_v31  ;;  %2441 = vrcp.f32 %v2688_v60  ;;  %v1054_v8 = vld [vmem:[#allocation10 + $0x18] sm:$0xff]  ;;  %v1053_v31 = vld [vmem:[#allocation10 + $0x10] sm:$0xff] }
 0x767   :  { %v735_v12 = vpop.permute.xlu0 %734  ;;  %v2397_v60 = vld [vmem:[%s3278_s13] ss:$0 sm:$0xff] }
 0x768   :  { %v885_v13 = vmul.f32 %v2440_v16, %v884_v10  ;;  %755 = vmatpush.msrb.mxu1 %v735_v12  ;;  %v871_v15 = vadd.f32 %v2438_v4, %v870_v9  ;;  %v1052_v9 = vld [vmem:[#allocation10 + $0x8] sm:$0xff]  ;;  %v1051_v10 = vld [vmem:[#allocation10] sm:$0xff] }
 0x769   :  { %2281 = vmatmul.msk.f32.vlgmr.msrb.gmra.mxu1 %vm236_vm1, %v707_v11 }
 0x76a   :  { %v886_v17 = vadd.f32 %v2440_v16, %v885_v13  ;;  %v875_v23 = vsel %vm874_vm15, %v2438_v4, %v871_v15  ;;  %v1097_v15 = vld [vmem:[%s3277_s12 + $0x38] sm:$0xff] }
 0x76b   :  { %v880_v28 = vsel %vm877_vm4, %v879_v25, %v875_v23  ;;  %1117 = vmatpush.msra.mxu2 %v1097_v15  ;;  %v1093_v25 = vld [vmem:[%s3277_s12 + $0x18] sm:$0xff]  ;;  %v2304_v15 = vld [vmem:[%s3269_s4 + $0x28] sm:$0xff] }
 0x76c   :  { %v890_v24 = vsel %vm889_vm3, %v2440_v16, %v886_v17  ;;  %v881_v35 = vmul.f32 %v2943_v53, %v880_v28  ;;  %v2442_v61 = vpop.eup %2441  ;;  %v1096_v17 = vld [vmem:[%s3277_s12 + $0x30] sm:$0xff] }
 0x76d   :  { %v895_v30 = vsel %vm892_vm5, %v894_v26, %v890_v24  ;;  %v997_v62 = vmul.f32 32.0, %v2442_v61  ;;  %vm1001_vm6 = vweird.f32 %v2442_v61  ;;  %1118 = vmatpush.msra.mxu2 %v1096_v17  ;;  %v2297_v17 = vld [vmem:[%s3267_s2 + $0x28] sm:$0xff] }
 0x76e   :  { %v896_v36 = vmul.f32 %v2947_v55, %v895_v30 }
 0x76f   :  { %v998_v63 = vsub.f32 1.0, %v997_v62  ;;  %1119 = vmatpush.msra.mxu2 %v1095_v18  ;;  %v2303_v18 = vld [vmem:[%s3269_s4 + $0x20] sm:$0xff] }
 0x771   :  { %v999_v29 = vmul.f32 %v2442_v61, %v998_v63  ;;  %1120 = vmatpush.msra.mxu2 %v1094_v22 }
 0x772   :  { %v2383_v32 = vpop.permute.xlu1 %2382 }
 0x773   :  { %v2385_v33 = vunpack.i.h.bf16 %v2383_v32  ;;  %v2384_v34 = vunpack.i.l.bf16 %v2383_v32  ;;  %v1000_v0 = vadd.f32 %v2442_v61, %v999_v29  ;;  %1121 = vmatpush.msra.mxu2 %v1093_v25 }
 0x775   :  { %918 = vmatpush.msra.mxu1 %v2384_v34  ;;  %944 = vmatpush.msra.mxu3 %v2385_v33 }
 0x776   :  { %2288 = vmatmul.msk.f32.vlgmr.msra.gmra.mxu1 %vm236_vm1, %v881_v35  ;;  %2289 = vmatmul.msk.f32.vlgmr.msra.gmra.mxu3 %vm236_vm1, %v896_v36  ;;  %v2394_v36 = vld [vmem:[#allocation8] ss:$0 sm:$0xff] }
 0x777   :  { %1077 = vmatpush.msrb.mxu1 %v1054_v8 }
 0x779   :  { %1078 = vmatpush.msrb.mxu1 %v1053_v31 }
 0x77b   :  { %1079 = vmatpush.msrb.mxu1 %v1052_v9 }
 0x77d   :  { %1080 = vmatpush.msrb.mxu1 %v1051_v10  ;;  %v2306_v10 = vld [vmem:[%s3269_s4 + $0x38] sm:$0xff] }
 0x77e   :  { %1259 = vmatpush.msra.mxu0 %v2306_v10 }
 0x7e6   :  { %v757_v38 = vpop.f32.mrf.mxu1 }
 0x7e7   :  { %2283 = vmatmul.msk.f32.gmra.mxu2 %vm236_vm1, %v757_v38 }
 0x7f3   :  { %v920_v39 = vpop.f32.mrf.mxu1 }
 0x7f4   :  { %2290 = vmatmul.msk.f32.vlgmr.msrb.gmra.mxu0 %vm236_vm1, %v920_v39 }
 0x7f9   :  { %v946_v40 = vpop.f32.mrf.mxu3 }
 0x7fc   :  { %2291 = vmatmul.msk.f32.gmra.mxu0 %vm236_vm1, %v946_v40  ;;  %v2395_v40 = vld [vmem:[%s3274_s9] ss:$0 sm:$0xff] }
 0x86a   :  { %v786_v51 = vpop.f32.mrf.mxu2 }
 0x86b   :  { %v790_v54 = vadd.f32 %v786_v51, %v600_v52  ;;  %v1092_v51 = vld [vmem:[%s3277_s12 + $0x10] sm:$0xff]  ;;  %v1091_v52 = vld [vmem:[%s3277_s12 + $0x8] sm:$0xff] }
 0x86c   :  { %1122 = vmatpush.msra.mxu2 %v1092_v51 }
 0x86e   :  { %1123 = vmatpush.msra.mxu2 %v1091_v52 }
 0x871   :  { %v972_v48 = vpop.f32.mrf.mxu0 }
 0x872   :  { %v978_v49 = vadd.f32 %v972_v48, %v789_v45 }
 0x874   :  { %v984_v50 = vadd.f32 %v2393_v47, %v978_v49 }
 0x876   :  { %v986_v53 = vadd.f32 %v984_v50, %v2808_v2  ;;  %v2976_v2 = vsel %vm1001_vm6, %v2442_v61, %v1000_v0 }
 0x878   :  { %v990_v55 = vsel %vm162_vm0, %v986_v53, 0.0 }
 0x879   :  { %991 = vadd.xlane.f32.xlu2 %v990_v55  ;;  %v975_v56 = vpop.f32.mrf.mxu0 }
 0x87a   :  { %v979_v57 = vadd.f32 %v975_v56, %v790_v54  ;;  %v2396_v54 = vld [vmem:[%s3276_s11] ss:$0 sm:$0xff] }
 0x87c   :  { %v985_v27 = vadd.f32 %v2393_v47, %v979_v57 }
 0x87e   :  { %v987_v58 = vadd.f32 %v985_v27, %v2850_v19 }
 0x880   :  { %v993_v59 = vsel %vm162_vm0, %v987_v58, 0.0 }
 0x881   :  { %994 = vadd.xlane.f32.xlu2 %v993_v59 }
 0x8ec   :  { %v992_v1 = vpop.xlane.xlu2 %991 }
 0x8ed   :  { %v1003_v3 = vmul.f32 %v2976_v2, %v992_v1 }
 0x8ef   :  { %v1005_v4 = vsub.f32 %v986_v53, %v1003_v3  ;;  %v1090_v53 = vld [vmem:[%s3277_s12] sm:$0xff] }
 0x8f0   :  { %1124 = vmatpush.msra.mxu2 %v1090_v53 }
 0x8f1   :  { %v1007_v5 = vmul.f32 %v1005_v4, %v1005_v4 }
 0x8f3   :  { %v1009_v19 = vsel %vm162_vm0, %v1007_v5, 0.0 }
 0x8f4   :  { %1010 = vadd.xlane.f32.xlu0 %v1009_v19  ;;  %v995_v14 = vpop.xlane.xlu2 %994 }
 0x8f5   :  { %v1004_v16 = vmul.f32 %v2976_v2, %v995_v14 }
 0x8f7   :  { %v1006_v46 = vsub.f32 %v987_v58, %v1004_v16 }
 0x8f9   :  { %v1008_v6 = vmul.f32 %v1006_v46, %v1006_v46 }
 0x8fb   :  { %v1012_v7 = vsel %vm162_vm0, %v1008_v6, 0.0 }
 0x8fc   :  { %1013 = vadd.xlane.f32.xlu2 %v1012_v7 }
 0x967   :  { %v1011_v11 = vpop.xlane.xlu0 %1010 }
 0x968   :  { %v1015_v12 = vmul.f32 %v1011_v11, %v2976_v2  ;;  %v2299_v11 = vld [vmem:[%s3267_s2 + $0x38] sm:$0xff] }
 0x969   :  { %1220 = vmatpush.msrb.mxu3 %v2299_v11 }
 0x96a   :  { %v1017_v13 = vadd.f32 1e-05, %v1015_v12  ;;  %v2305_v12 = vld [vmem:[%s3269_s4 + $0x30] sm:$0xff] }
 0x96b   :  { %1260 = vmatpush.msra.mxu0 %v2305_v12 }
 0x96c   :  { %2443 = vrsqrt.f32 %v1017_v13  ;;  %vm1025_vm8 = vweird.f32 %v1017_v13 }
 0x96d   :  { %1261 = vmatpush.msra.mxu0 %v2304_v15 }
 0x96f   :  { %v1014_v20 = vpop.xlane.xlu2 %1013  ;;  %1262 = vmatpush.msra.mxu0 %v2303_v18 }
 0x970   :  { %v1016_v21 = vmul.f32 %v1014_v20, %v2976_v2  ;;  %v2296_v20 = vld [vmem:[%s3267_s2 + $0x20] sm:$0xff] }
 0x972   :  { %v2444_v23 = vpop.eup %2443  ;;  %v1018_v24 = vadd.f32 1e-05, %v1016_v21 }
 0x973   :  { %v1020_v26 = vmul.f32 %v2444_v23, %v1017_v13  ;;  %vm1026_vm7 = vweird.f32 %v2444_v23  ;;  %v2298_v13 = vld [vmem:[%s3267_s2 + $0x30] sm:$0xff] }
 0x974   :  { %2445 = vrsqrt.f32 %v1018_v24  ;;  %vm1027_vm9 = vmor %vm1025_vm8, %vm1026_vm7  ;;  %vm1035_vm11 = vweird.f32 %v1018_v24  ;;  %1221 = vmatpush.msrb.mxu3 %v2298_v13 }
 0x975   :  { %v1021_v28 = vmul.f32 %v2444_v23, %v1020_v26 }
 0x976   :  { %1222 = vmatpush.msrb.mxu3 %v2297_v17 }
 0x977   :  { %v1022_v30 = vmul.f32 0.5, %v1021_v28 }
 0x978   :  { %1223 = vmatpush.msrb.mxu3 %v2296_v20 }
 0x979   :  { %v1023_v32 = vsub.f32 1.5, %v1022_v30 }
 0x97a   :  { %v2446_v33 = vpop.eup %2445 }
 0x97b   :  { %v1024_v34 = vmul.f32 %v2444_v23, %v1023_v32  ;;  %v1030_v35 = vmul.f32 %v2446_v33, %v1018_v24  ;;  %vm1036_vm10 = vweird.f32 %v2446_v33 }
 0x97c   :  { %vm1037_vm12 = vmor %vm1035_vm11, %vm1036_vm10 }
 0x97d   :  { %v1028_v37 = vsel %vm1027_vm9, %v2444_v23, %v1024_v34  ;;  %v1031_v38 = vmul.f32 %v2446_v33, %v1030_v35 }
 0x97e   :  { %v1039_v39 = vmul.f32 %v1028_v37, %v1005_v4 }
 0x97f   :  { %v1032_v41 = vmul.f32 0.5, %v1031_v38  ;;  %v2398_v38 = vld [vmem:[#allocation11] ss:$0 sm:$0xff] }
 0x980   :  { %v1044_v42 = vmul.f32 %v2394_v36, %v1039_v39 }
 0x981   :  { %v1033_v43 = vsub.f32 1.5, %v1032_v41 }
 0x982   :  { %v1049_v44 = vadd.f32 %v2395_v40, %v1044_v42  ;;  %v2399_v42 = vld [vmem:[%s3280_s15] ss:$0 sm:$0xff] }
 0x983   :  { %v1034_v45 = vmul.f32 %v2446_v33, %v1033_v43 }
 0x984   :  { %2292 = vmatmul.msk.f32.vlgmr.msrb.gmra.mxu1 %vm162_vm0, %v1049_v44 }
 0x985   :  { %v1038_v47 = vsel %vm1037_vm12, %v2446_v33, %v1034_v45 }
 0x986   :  { %v1040_v48 = vmul.f32 %v1038_v47, %v1006_v46 }
 0x988   :  { %v1045_v49 = vmul.f32 %v2394_v36, %v1040_v48 }
 0x98a   :  { %v1050_v50 = vadd.f32 %v2395_v40, %v1045_v49  ;;  %v2491_v49 = vld [vmem:[#allocation5] sm:$0xff] }
 0x98c   :  { %2293 = vmatmul.msk.f32.gmra.mxu1 %vm162_vm0, %v1050_v50 }
 0xa01   :  { %v1082_v55 = vpop.f32.mrf.mxu1 }
 0xa02   :  { %v1083_v56 = vadd.f32 %v2396_v54, %v1082_v55  ;;  %v2492_v55 = vld [vmem:[#allocation5 + $0x8] sm:$0xff] }
 0xa04   :  { %v1088_v57 = vmax.f32 %v1083_v56, 0.0 }
 0xa06   :  { %2294 = vmatmul.msk.f32.vlgmr.msra.gmra.mxu2 %vm1102_vm13, %v1088_v57  ;;  %v2400_v57 = vld [vmem:[#allocation7 + $0x1] ss:$0 sm:$0xff] }
 0xa09   :  { %v1085_v27 = vpop.f32.mrf.mxu1 }
 0xa0a   :  { %v1086_v58 = vadd.f32 %v2396_v54, %v1085_v27 }
 0xa0c   :  { %v1089_v59 = vmax.f32 %v1086_v58, 0.0 }
 0xa0e   :  { %2295 = vmatmul.msk.f32.gmra.mxu2 %vm1102_vm13, %v1089_v59  ;;  %v2401_v59 = vld [vmem:[%s3268_s3 + $0x1] ss:$0 sm:$0xff] }
 0xa89   :  { %v1126_v61 = vpop.f32.mrf.mxu2 }
 0xa8a   :  { %v1127_v62 = vadd.f32 %v2397_v60, %v1126_v61 }
 0xa8c   :  { %v1132_v63 = vadd.f32 %v1127_v62, %v1049_v44 }
 0xa8e   :  { %v1136_v29 = vsel %vm162_vm0, %v1132_v63, 0.0 }
 0xa8f   :  { %1137 = vadd.xlane.f32.xlu1 %v1136_v29 }
 0xa91   :  { %v1129_v0 = vpop.f32.mrf.mxu2 }
 0xa92   :  { %v1130_v1 = vadd.f32 %v2397_v60, %v1129_v0 }
 0xa94   :  { %v1133_v3 = vadd.f32 %v1130_v1, %v1050_v50 }
 0xa96   :  { %v1139_v4 = vsel %vm162_vm0, %v1133_v3, 0.0 }
 0xa97   :  { %1140 = vadd.xlane.f32.xlu2 %v1139_v4 }
 0xb02   :  { %v1138_v5 = vpop.xlane.xlu1 %1137 }
 0xb03   :  { %v1142_v19 = vmul.f32 %v1138_v5, %v2976_v2 }
 0xb05   :  { %v1144_v14 = vsub.f32 %v1132_v63, %v1142_v19 }
 0xb07   :  { %v1146_v16 = vmul.f32 %v1144_v14, %v1144_v14 }
 0xb09   :  { %v1148_v46 = vsel %vm162_vm0, %v1146_v16, 0.0 }
 0xb0a   :  { %1149 = vadd.xlane.f32.xlu2 %v1148_v46  ;;  %v1141_v6 = vpop.xlane.xlu2 %1140 }
 0xb0b   :  { %v1143_v7 = vmul.f32 %v1141_v6, %v2976_v2 }
 0xb0d   :  { %v1145_v8 = vsub.f32 %v1133_v3, %v1143_v7 }
 0xb0f   :  { %v1147_v31 = vmul.f32 %v1145_v8, %v1145_v8 }
 0xb11   :  { %v1151_v9 = vsel %vm162_vm0, %v1147_v31, 0.0 }
 0xb12   :  { %1152 = vadd.xlane.f32.xlu2 %v1151_v9 }
 0xb7d   :  { %v1150_v21 = vpop.xlane.xlu2 %1149 }
 0xb7e   :  { %v1154_v22 = vmul.f32 %v1150_v21, %v2976_v2 }
 0xb80   :  { %v1156_v23 = vadd.f32 1e-05, %v1154_v22 }
 0xb82   :  { %2447 = vrsqrt.f32 %v1156_v23  ;;  %vm1164_vm15 = vweird.f32 %v1156_v23 }
 0xb85   :  { %v1153_v24 = vpop.xlane.xlu2 %1152 }
 0xb86   :  { %v1155_v25 = vmul.f32 %v1153_v24, %v2976_v2 }
 0xb88   :  { %v2448_v26 = vpop.eup %2447  ;;  %v1157_v28 = vadd.f32 1e-05, %v1155_v25 }
 0xb89   :  { %v1159_v30 = vmul.f32 %v2448_v26, %v1156_v23  ;;  %vm1165_vm14 = vweird.f32 %v2448_v26 }
 0xb8a   :  { %2449 = vrsqrt.f32 %v1157_v28  ;;  %vm1166_vm2 = vmor %vm1164_vm15, %vm1165_vm14  ;;  %vm1174_vm4 = vweird.f32 %v1157_v28 }
 0xb8b   :  { %v1160_v32 = vmul.f32 %v2448_v26, %v1159_v30 }
 0xb8d   :  { %v1161_v33 = vmul.f32 0.5, %v1160_v32 }
 0xb8f   :  { %v1162_v34 = vsub.f32 1.5, %v1161_v33 }
 0xb90   :  { %v2450_v35 = vpop.eup %2449 }
 0xb91   :  { %v1163_v36 = vmul.f32 %v2448_v26, %v1162_v34  ;;  %v1169_v37 = vmul.f32 %v2450_v35, %v1157_v28  ;;  %vm1175_vm3 = vweird.f32 %v2450_v35 }
 0xb92   :  { %vm1176_vm5 = vmor %vm1174_vm4, %vm1175_vm3 }
 0xb93   :  { %v1167_v39 = vsel %vm1166_vm2, %v2448_v26, %v1163_v36  ;;  %v1170_v40 = vmul.f32 %v2450_v35, %v1169_v37 }
 0xb94   :  { %v1178_v41 = vmul.f32 %v1167_v39, %v1144_v14 }
 0xb95   :  { %v1171_v43 = vmul.f32 0.5, %v1170_v40 }
 0xb96   :  { %v1183_v44 = vmul.f32 %v2398_v38, %v1178_v41 }
 0xb97   :  { %v1172_v45 = vsub.f32 1.5, %v1171_v43 }
 0xb98   :  { %v3056_v47 = vadd.f32 %v2399_v42, %v1183_v44 }
 0xb99   :  { %v1173_v48 = vmul.f32 %v2450_v35, %v1172_v45 }
 0xb9a   :  { %2307 = vmatmul.msk.f32.vlgmr.msra.gmra.mxu0 %vm162_vm0, %v3056_v47  ;;  %v1190_v50 = vadd.f32 %v2491_v49, %v3056_v47 }
 0xb9b   :  { %v1177_v51 = vsel %vm1176_vm5, %v2450_v35, %v1173_v48 }
 0xb9c   :  { %2301 = vmatmul.msk.f32.vlgmr.msrb.gmra.mxu3 %vm162_vm0, %v1190_v50  ;;  %v1179_v52 = vmul.f32 %v1177_v51, %v1145_v8 }
 0xb9e   :  { %v1184_v53 = vmul.f32 %v2398_v38, %v1179_v52 }
 0xba0   :  { %v3062_v54 = vadd.f32 %v2399_v42, %v1184_v53 }
 0xba2   :  { %2308 = vmatmul.msk.f32.gmra.mxu0 %vm162_vm0, %v3062_v54  ;;  %v1191_v56 = vadd.f32 %v2492_v55, %v3062_v54 }
 0xba4   :  { %2302 = vmatmul.msk.f32.gmra.mxu3 %vm162_vm0, %v1191_v56 }
 0xc17   :  { %v1264_v27 = vpop.f32.mrf.mxu0 }
 0xc18   :  { %v3068_v58 = vadd.f32 %v2400_v57, %v1264_v27 }
 0xc1a   :  { %1397 = vmatpush.msra.mxu3 %v3068_v58 }
 0xc1f   :  { %v1225_v60 = vpop.f32.mrf.mxu3  ;;  %v1267_v29 = vpop.f32.mrf.mxu0 }
 0xc20   :  { %v3074_v61 = vadd.f32 %v2401_v59, %v1225_v60  ;;  %v3086_v0 = vadd.f32 %v2400_v57, %v1267_v29 }
 0xc22   :  { %1427 = vrot.lane.b32.xlu1 %v3074_v61, %s2681_s20  ;;  %1276 = vrot.lane.b32.xlu2 %v3074_v61, %s2682_s10 }
 0xc27   :  { %v1228_v62 = vpop.f32.mrf.mxu3 }
 0xc28   :  { %v3080_v63 = vadd.f32 %v2401_v59, %v1228_v62 }
 0xc2a   :  { %1425 = vrot.lane.b32.xlu2 %v3074_v61, %s2683_s14  ;;  %1303 = vrot.lane.b32.xlu0 %v3080_v63, %s2682_s10 }
 0xc7c   :  { %v1277_v1 = vpop.permute.xlu2 %1276 }
 0xc7d   :  { %2313 = vmatpush.xpose.msk.msra.mxu1 %vm236_vm1, %v1277_v1 }
 0xc80   :  { %2314 = vmatmul.msk.f32.vlgmr.msra.gmra.mxu1 %vm236_vm1, %v3074_v61 }
 0xc81   :  { %1420 = vmatpush.msrb.mxu1 %v3086_v0 }
 0xc84   :  { %v1426_v5 = vpop.permute.xlu2 %1425 }
 0xc94   :  { %v1428_v4 = vpop.permute.xlu1 %1427 }
 0xc9c   :  { %v1304_v3 = vpop.permute.xlu0 %1303 }
 0xc9d   :  { %2315 = vmatpush.xpose.msk.msrb.mxu2 %vm236_vm1, %v1304_v3  ;;  %v2309_v3 = vld [vmem:[%s3271_s6 + $0x20] sm:$0xff] }
 0xca0   :  { %2316 = vmatmul.msk.f32.vlgmr.msrb.gmra.mxu2 %vm236_vm1, %v3080_v63 }
 0xca1   :  { %2319 = vmatpush.xpose.msk.msra.mxu2 %vm236_vm1, %v1428_v4 }
 0xca8   :  { %2320 = vmatmul.msk.f32.vlgmr.msra.gmra.mxu2 %vm236_vm1, %v1426_v5 }
 0xcfd   :  { %v1299_v19 = vpop.f32.mrf.mxu1 }
 0xcfe   :  { %v1329_v14 = vmul.f32 0.35355338, %v1299_v19 }
 0xd00   :  { %v1331_v16 = vsel %vm236_vm1, %v1329_v14, -inf }
 0xd01   :  { %1332 = vmax.xlane.f32.xlu0 %v1331_v16 }
 0xd15   :  { %1453 = vrot.lane.b32.xlu0 %v3080_v63, %s2683_s14 }
 0xd23   :  { %v1326_v46 = vpop.f32.mrf.mxu2 }
 0xd24   :  { %v1330_v31 = vmul.f32 0.35355338, %v1326_v46 }
 0xd26   :  { %v1334_v12 = vsel %vm236_vm1, %v1330_v31, -inf }
 0xd2b   :  { %v1450_v6 = vpop.f32.mrf.mxu2 }
 0xd2c   :  { %v1481_v7 = vmul.f32 0.35355338, %v1450_v6 }
 0xd2e   :  { %v1483_v8 = vsel %vm236_vm1, %v1481_v7, -inf }
 0xd2f   :  { %1484 = vmax.xlane.f32.xlu2 %v1483_v8 }
 0xd47   :  { %1455 = vrot.lane.b32.xlu2 %v3080_v63, %s2681_s20 }
 0xd4f   :  { %1645 = vrot.lane.b32.xlu2 %v3074_v61, %s2684_s24 }
 0xd74   :  { %v1333_v9 = vpop.xlane.xlu0 %1332 }
 0xd75   :  { %v1337_v10 = vsub.f32 %v1329_v14, %v1333_v9 }
 0xd77   :  { %v1339_v11 = vmul.f32 1.442695, %v1337_v10 }
 0xd78   :  { %1335 = vmax.xlane.f32.xlu2 %v1334_v12  ;;  %v2310_v12 = vld [vmem:[%s3271_s6 + $0x28] sm:$0xff] }
 0xd79   :  { %2451 = vpow2.f32 %v1339_v11  ;;  %1606 = vmatpush.msrb.mxu2 %v2310_v12 }
 0xd7f   :  { %v2452_v13 = vpop.eup %2451 }
 0xd80   :  { %v1343_v15 = vsel %vm236_vm1, %v2452_v13, 0.0 }
 0xd81   :  { %1344 = vadd.xlane.f32.xlu1 %v1343_v15 }
 0xd87   :  { %v1454_v48 = vpop.permute.xlu0 %1453 }
 0xd9a   :  { %1532 = vrot.lane.b32.xlu1 %v3068_v58, %s2683_s14 }
 0xda2   :  { %v1485_v17 = vpop.xlane.xlu2 %1484 }
 0xda3   :  { %v1489_v18 = vsub.f32 %v1481_v7, %v1485_v17 }
 0xda5   :  { %v1491_v20 = vmul.f32 1.442695, %v1489_v18 }
 0xda7   :  { %2453 = vpow2.f32 %v1491_v20 }
 0xdaa   :  { %v1456_v21 = vpop.permute.xlu2 %1455 }
 0xdab   :  { %2321 = vmatpush.xpose.msk.msrb.mxu3 %vm236_vm1, %v1456_v21 }
 0xdad   :  { %v2454_v22 = vpop.eup %2453 }
 0xdae   :  { %v1495_v23 = vsel %vm236_vm1, %v2454_v22, 0.0 }
 0xdaf   :  { %1496 = vadd.xlane.f32.xlu0 %v1495_v23 }
 0xdb2   :  { %v1646_v24 = vpop.permute.xlu2 %1645 }
 0xdc3   :  { %1643 = vrot.lane.b32.xlu0 %v3074_v61, %s2685_s23 }
 0xdeb   :  { %v1336_v25 = vpop.xlane.xlu2 %1335 }
 0xdec   :  { %v1338_v26 = vsub.f32 %v1330_v31, %v1336_v25 }
 0xdee   :  { %v1341_v28 = vmul.f32 1.442695, %v1338_v26 }
 0xdf0   :  { %2455 = vpow2.f32 %v1341_v28 }
 0xdf4   :  { %v1345_v30 = vpop.xlane.xlu1 %1344 }
 0xdf5   :  { %2457 = vrcp.f32 %v1345_v30  ;;  %v1360_v37 = vand.u32 2147483648, %v1345_v30  ;;  %v1358_v39 = vand.u32 2147483647, %v1345_v30  ;;  %vm1354_vm7 = vweird.f32 %v1345_v30 }
 0xdf6   :  { %v3113_v32 = vpop.eup %2455 }
 0xdf7   :  { %v1346_v33 = vsel %vm236_vm1, %v3113_v32, 0.0  ;;  %v1361_v41 = vor.u32 1.1754944e-38, %v1360_v37  ;;  %vm1359_vm9 = vcmp.eq.f32.partialorder %v1358_v39, 8.507059e+37 }
 0xdf8   :  { %1347 = vadd.xlane.f32.xlu0 %v1346_v33 }
 0xdfb   :  { %v2458_v34 = vpop.eup %2457 }
 0xdfc   :  { %v1350_v35 = vmul.f32 %v2458_v34, %v1345_v30  ;;  %vm1355_vm6 = vweird.f32 %v2458_v34 }
 0xdfd   :  { %vm1356_vm8 = vmor %vm1354_vm7, %vm1355_vm6 }
 0xdfe   :  { %v1351_v36 = vsub.f32 1.0, %v1350_v35 }
 0xe00   :  { %v1352_v38 = vmul.f32 %v2458_v34, %v1351_v36 }
 0xe02   :  { %v1353_v40 = vadd.f32 %v2458_v34, %v1352_v38 }
 0xe04   :  { %v1357_v42 = vsel %vm1356_vm8, %v2458_v34, %v1353_v40 }
 0xe05   :  { %v1362_v43 = vsel %vm1359_vm9, %v1361_v41, %v1357_v42 }
 0xe06   :  { %v1363_v44 = vmul.f32 %v2452_v13, %v1362_v43 }
 0xe08   :  { %2317 = vmatmul.msk.f32.vlgmr.msra.gmra.mxu3 %vm236_vm1, %v1363_v44 }
 0xe09   :  { %1635 = vmatpush.msra.mxu3 %v2309_v3 }
 0xe0c   :  { %v1533_v45 = vpop.permute.xlu1 %1532 }
 0xe0d   :  { %1553 = vmatpush.msrb.mxu0 %v1533_v45 }
 0xe0f   :  { %2329 = vmatpush.xpose.msk.msra.mxu0 %vm236_vm1, %v1646_v24 }
 0xe10   :  { %2322 = vmatmul.msk.f32.vlgmr.msrb.gmra.mxu3 %vm236_vm1, %v1454_v48 }
 0xe22   :  { %v1497_v49 = vpop.xlane.xlu0 %1496 }
 0xe23   :  { %2459 = vrcp.f32 %v1497_v49  ;;  %v1512_v53 = vand.u32 2147483648, %v1497_v49  ;;  %v1510_v56 = vand.u32 2147483647, %v1497_v49  ;;  %vm1506_vm11 = vweird.f32 %v1497_v49 }
 0xe25   :  { %v1513_v27 = vor.u32 1.1754944e-38, %v1512_v53  ;;  %vm1511_vm14 = vcmp.eq.f32.partialorder %v1510_v56, 8.507059e+37 }
 0xe29   :  { %v2460_v50 = vpop.eup %2459 }
 0xe2a   :  { %v1502_v51 = vmul.f32 %v2460_v50, %v1497_v49  ;;  %vm1507_vm10 = vweird.f32 %v2460_v50 }
 0xe2b   :  { %vm1508_vm12 = vmor %vm1506_vm11, %vm1507_vm10 }
 0xe2c   :  { %v1503_v52 = vsub.f32 1.0, %v1502_v51 }
 0xe2e   :  { %v1504_v55 = vmul.f32 %v2460_v50, %v1503_v52 }
 0xe30   :  { %v1505_v57 = vadd.f32 %v2460_v50, %v1504_v55 }
 0xe32   :  { %v1509_v59 = vsel %vm1508_vm12, %v2460_v50, %v1505_v57 }
 0xe33   :  { %v1514_v60 = vsel %vm1511_vm14, %v1513_v27, %v1509_v59 }
 0xe34   :  { %v1515_v62 = vmul.f32 %v2454_v22, %v1514_v60 }
 0xe35   :  { %v1644_v29 = vpop.permute.xlu0 %1643 }
 0xe36   :  { %2323 = vmatmul.msk.f32.vlgmr.msrb.gmra.mxu0 %vm236_vm1, %v1515_v62 }
 0xe3e   :  { %2330 = vmatmul.msk.f32.vlgmr.msra.gmra.mxu0 %vm236_vm1, %v1644_v29 }
 0xe6b   :  { %v1348_v1 = vpop.xlane.xlu0 %1347 }
 0xe6c   :  { %2461 = vrcp.f32 %v1348_v1  ;;  %v1375_v14 = vand.u32 2147483648, %v1348_v1  ;;  %v1373_v46 = vand.u32 2147483647, %v1348_v1  ;;  %vm1369_vm2 = vweird.f32 %v1348_v1 }
 0xe6e   :  { %v1376_v7 = vor.u32 1.1754944e-38, %v1375_v14  ;;  %vm1374_vm4 = vcmp.eq.f32.partialorder %v1373_v46, 8.507059e+37 }
 0xe72   :  { %v2462_v4 = vpop.eup %2461 }
 0xe73   :  { %v1365_v5 = vmul.f32 %v2462_v4, %v1348_v1  ;;  %vm1370_vm15 = vweird.f32 %v2462_v4 }
 0xe74   :  { %vm1371_vm3 = vmor %vm1369_vm2, %vm1370_vm15 }
 0xe75   :  { %v1366_v19 = vsub.f32 1.0, %v1365_v5 }
 0xe77   :  { %v1367_v16 = vmul.f32 %v2462_v4, %v1366_v19 }
 0xe79   :  { %v1368_v6 = vadd.f32 %v2462_v4, %v1367_v16 }
 0xe7b   :  { %v1372_v8 = vsel %vm1371_vm3, %v2462_v4, %v1368_v6  ;;  %v2311_v6 = vld [vmem:[%s3271_s6 + $0x30] sm:$0xff] }
 0xe7c   :  { %v1377_v31 = vsel %vm1374_vm4, %v1376_v7, %v1372_v8  ;;  %1822 = vmatpush.msra.mxu2 %v2311_v6 }
 0xe7d   :  { %v1378_v9 = vmul.f32 %v3113_v32, %v1377_v31 }
 0xe7f   :  { %2318 = vmatmul.msk.f32.vlgmr.msrb.gmra.mxu1 %vm236_vm1, %v1378_v9 }
 0xe8b   :  { %v1399_v10 = vpop.f32.mrf.mxu3 }
 0xe8c   :  { %2327 = vmatmul.msk.f32.vlgmr.msra.gmra.mxu3 %vm236_vm1, %v1399_v10 }
 0xe93   :  { %v1478_v11 = vpop.f32.mrf.mxu3 }
 0xe94   :  { %v1482_v13 = vmul.f32 0.35355338, %v1478_v11 }
 0xe96   :  { %v1486_v15 = vsel %vm236_vm1, %v1482_v13, -inf }
 0xe97   :  { %1487 = vmax.xlane.f32.xlu1 %v1486_v15 }
 0xeb0   :  { %1834 = vrot.lane.b32.xlu1 %v3074_v61, %s2687_s0 }
 0xeb3   :  { %v1555_v17 = vpop.f32.mrf.mxu0 }
 0xeb4   :  { %2325 = vmatmul.msk.f32.vlgmr.msrb.gmra.mxu2 %vm236_vm1, %v1555_v17 }
 0xebb   :  { %v1668_v18 = vpop.f32.mrf.mxu0 }
 0xebc   :  { %v1699_v20 = vmul.f32 0.35355338, %v1668_v18 }
 0xebe   :  { %v1701_v21 = vsel %vm236_vm1, %v1699_v20, -inf }
 0xebf   :  { %1702 = vmax.xlane.f32.xlu2 %v1701_v21 }
 0xed7   :  { %1559 = vrot.lane.b32.xlu2 %v3086_v0, %s2683_s14 }
 0xedf   :  { %1749 = vrot.lane.b32.xlu2 %v3068_v58, %s2685_s23 }
 0xee7   :  { %1860 = vrot.lane.b32.xlu2 %v3080_v63, %s2686_s29 }
 0xefc   :  { %v1422_v22 = vpop.f32.mrf.mxu1 }
 0xefd   :  { %2328 = vmatmul.msk.f32.gmra.mxu3 %vm236_vm1, %v1422_v22 }
 0xf0a   :  { %v1488_v23 = vpop.xlane.xlu1 %1487 }
 0xf0b   :  { %v1490_v24 = vsub.f32 %v1482_v13, %v1488_v23 }
 0xf0d   :  { %v1493_v25 = vmul.f32 1.442695, %v1490_v24 }
 0xf0f   :  { %2463 = vpow2.f32 %v1493_v25  ;;  %v3166_v31 = vpop.f32.mrf.mxu3 }
 0xf15   :  { %v2464_v26 = vpop.eup %2463 }
 0xf16   :  { %v1498_v28 = vsel %vm236_vm1, %v2464_v26, 0.0 }
 0xf17   :  { %1499 = vadd.xlane.f32.xlu0 %v1498_v28 }
 0xf22   :  { %v1835_v30 = vpop.permute.xlu1 %1834 }
 0xf23   :  { %2337 = vmatpush.xpose.msk.msrb.mxu3 %vm236_vm1, %v1835_v30 }
 0xf2b   :  { %1673 = vrot.lane.b32.xlu0 %v3080_v63, %s2684_s24 }
 0xf32   :  { %v1703_v32 = vpop.xlane.xlu2 %1702 }
 0xf33   :  { %v1707_v33 = vsub.f32 %v1699_v20, %v1703_v32  ;;  %1671 = vrot.lane.b32.xlu0 %v3080_v63, %s2685_s23 }
 0xf35   :  { %v1709_v34 = vmul.f32 1.442695, %v1707_v33 }
 0xf37   :  { %2465 = vpow2.f32 %v1709_v34 }
 0xf3a   :  { %v1560_v35 = vpop.permute.xlu2 %1559 }
 0xf3b   :  { %1862 = vrot.lane.b32.xlu0 %v3080_v63, %s2687_s0  ;;  %1580 = vmatpush.msra.mxu1 %v1560_v35 }
 0xf3d   :  { %v2466_v36 = vpop.eup %2465 }
 0xf3e   :  { %v1713_v37 = vsel %vm236_vm1, %v2466_v36, 0.0 }
 0xf3f   :  { %1714 = vadd.xlane.f32.xlu1 %v1713_v37 }
 0xf42   :  { %v1750_v38 = vpop.permute.xlu2 %1749 }
 0xf43   :  { %1770 = vmatpush.msrb.mxu0 %v1750_v38  ;;  %v2386_v38 = vpack.i.bf16 %v3086_v0, %v3068_v58 }
 0xf4a   :  { %v1861_v14 = vpop.permute.xlu2 %1860 }
 0xf58   :  { %1832 = vrot.lane.b32.xlu1 %v3074_v61, %s2686_s29 }
 0xf80   :  { %v3169_v10 = vpop.f32.mrf.mxu3 }
 0xf8a   :  { %v1500_v39 = vpop.xlane.xlu0 %1499 }
 0xf8b   :  { %2467 = vrcp.f32 %v1500_v39  ;;  %v1527_v43 = vand.u32 2147483648, %v1500_v39  ;;  %v1525_v45 = vand.u32 2147483647, %v1500_v39  ;;  %vm1521_vm6 = vweird.f32 %v1500_v39 }
 0xf8d   :  { %v1528_v48 = vor.u32 1.1754944e-38, %v1527_v43  ;;  %vm1526_vm8 = vcmp.eq.f32.partialorder %v1525_v45, 8.507059e+37 }
 0xf91   :  { %v2468_v40 = vpop.eup %2467 }
 0xf92   :  { %v1517_v41 = vmul.f32 %v2468_v40, %v1500_v39  ;;  %vm1522_vm5 = vweird.f32 %v2468_v40 }
 0xf93   :  { %vm1523_vm7 = vmor %vm1521_vm6, %vm1522_vm5 }
 0xf94   :  { %v1518_v42 = vsub.f32 1.0, %v1517_v41 }
 0xf96   :  { %v1519_v44 = vmul.f32 %v2468_v40, %v1518_v42 }
 0xf98   :  { %v1520_v63 = vadd.f32 %v2468_v40, %v1519_v44 }
 0xf9a   :  { %v1524_v49 = vsel %vm1523_vm7, %v2468_v40, %v1520_v63 }
 0xf9b   :  { %v1529_v50 = vsel %vm1526_vm8, %v1528_v48, %v1524_v49 }
 0xf9c   :  { %v1530_v51 = vmul.f32 %v2464_v26, %v1529_v50 }
 0xf9d   :  { %v1674_v52 = vpop.permute.xlu0 %1673 }
 0xf9e   :  { %2324 = vmatmul.msk.f32.vlgmr.msra.gmra.mxu1 %vm236_vm1, %v1530_v51 }
 0xf9f   :  { %2331 = vmatpush.xpose.msk.msrb.mxu1 %vm236_vm1, %v1674_v52 }
 0xfa5   :  { %v1672_v61 = vpop.permute.xlu0 %1671 }
 0xfa6   :  { %2332 = vmatmul.msk.f32.vlgmr.msrb.gmra.mxu1 %vm236_vm1, %v1672_v61 }
 0xfad   :  { %v1863_v53 = vpop.permute.xlu0 %1862 }
 0xfae   :  { %2339 = vmatpush.xpose.msk.msra.mxu0 %vm236_vm1, %v1863_v53 }
 0xfb2   :  { %v1715_v55 = vpop.xlane.xlu1 %1714 }
 0xfb3   :  { %2469 = vrcp.f32 %v1715_v55  ;;  %v1730_v59 = vand.u32 2147483648, %v1715_v55  ;;  %v1728_v62 = vand.u32 2147483647, %v1715_v55  ;;  %vm1724_vm10 = vweird.f32 %v1715_v55 }
 0xfb5   :  { %v1731_v1 = vor.u32 1.1754944e-38, %v1730_v59  ;;  %vm1729_vm12 = vcmp.eq.f32.partialorder %v1728_v62, 8.507059e+37 }
 0xfb9   :  { %v2470_v56 = vpop.eup %2469 }
 0xfba   :  { %v1720_v57 = vmul.f32 %v2470_v56, %v1715_v55  ;;  %vm1725_vm9 = vweird.f32 %v2470_v56 }
 0xfbb   :  { %vm1726_vm11 = vmor %vm1724_vm10, %vm1725_vm9 }
 0xfbc   :  { %v1721_v27 = vsub.f32 1.0, %v1720_v57 }
 0xfbe   :  { %v1722_v60 = vmul.f32 %v2470_v56, %v1721_v27 }
 0xfc0   :  { %v1723_v29 = vadd.f32 %v2470_v56, %v1722_v60 }
 0xfc2   :  { %v1727_v3 = vsel %vm1726_vm11, %v2470_v56, %v1723_v29 }
 0xfc3   :  { %v1732_v4 = vsel %vm1729_vm12, %v1731_v1, %v1727_v3 }
 0xfc4   :  { %v1733_v5 = vmul.f32 %v2466_v36, %v1732_v4 }
 0xfc6   :  { %2333 = vmatmul.msk.f32.vlgmr.msrb.gmra.mxu0 %vm236_vm1, %v1733_v5 }
 0xfca   :  { %v1833_v19 = vpop.permute.xlu1 %1832 }
 0xfcb   :  { %2338 = vmatmul.msk.f32.vlgmr.msrb.gmra.mxu3 %vm236_vm1, %v1833_v19 }
 0xfce   :  { %2340 = vmatmul.msk.f32.vlgmr.msra.gmra.mxu0 %vm236_vm1, %v1861_v14 }
0x101b   :  { %v1582_v16 = vpop.f32.mrf.mxu1 }
0x101c   :  { %2326 = vmatmul.msk.f32.gmra.mxu2 %vm236_vm1, %v1582_v16 }
0x1023   :  { %v1696_v46 = vpop.f32.mrf.mxu1 }
0x1024   :  { %v1700_v7 = vmul.f32 0.35355338, %v1696_v46 }
0x1026   :  { %v1704_v8 = vsel %vm236_vm1, %v1700_v7, -inf }
0x1027   :  { %1705 = vmax.xlane.f32.xlu1 %v1704_v8 }
0x1043   :  { %v1772_v9 = vpop.f32.mrf.mxu0 }
0x1044   :  { %2335 = vmatmul.msk.f32.vlgmr.msra.gmra.mxu2 %vm236_vm1, %v1772_v9 }
0x104b   :  { %v1885_v11 = vpop.f32.mrf.mxu0 }
0x104c   :  { %v1889_v12 = vmul.f32 0.35355338, %v1885_v11 }
0x104e   :  { %v1857_v13 = vpop.f32.mrf.mxu3  ;;  %v1893_v15 = vsel %vm236_vm1, %v1889_v12, -inf }
0x104f   :  { %v1888_v17 = vmul.f32 0.35355338, %v1857_v13  ;;  %1894 = vmax.xlane.f32.xlu2 %v1893_v15 }
0x1051   :  { %v1890_v18 = vsel %vm236_vm1, %v1888_v17, -inf }
0x1052   :  { %1891 = vmax.xlane.f32.xlu0 %v1890_v18 }
0x109a   :  { %v1706_v20 = vpop.xlane.xlu1 %1705 }
0x109b   :  { %v1708_v21 = vsub.f32 %v1700_v7, %v1706_v20 }
0x109d   :  { %v1711_v22 = vmul.f32 1.442695, %v1708_v21  ;;  %v1608_v21 = vpop.f32.mrf.mxu2 }
0x109f   :  { %2471 = vpow2.f32 %v1711_v22 }
0x10a5   :  { %v2472_v23 = vpop.eup %2471  ;;  %v1611_v22 = vpop.f32.mrf.mxu2 }
0x10a6   :  { %v1716_v24 = vsel %vm236_vm1, %v2472_v23, 0.0 }
0x10a7   :  { %1717 = vadd.xlane.f32.xlu1 %v1716_v24  ;;  %v1638_v24 = vadd.f32 %v3166_v31, %v1608_v21 }
0x10c0   :  { %1775 = vrot.lane.b32.xlu1 %v3086_v0, %s2685_s23 }
0x10c2   :  { %v1895_v25 = vpop.xlane.xlu2 %1894 }
0x10c3   :  { %v1897_v26 = vsub.f32 %v1889_v12, %v1895_v25 }
0x10c5   :  { %v1900_v28 = vmul.f32 1.442695, %v1897_v26  ;;  %v1892_v30 = vpop.xlane.xlu0 %1891  ;;  %v2402_v26 = vld [vmem:[%s3272_s7 + $0x1] ss:$0 sm:$0xff] }
0x10c6   :  { %v1896_v32 = vsub.f32 %v1888_v17, %v1892_v30  ;;  %v2312_v17 = vld [vmem:[%s3271_s6 + $0x38] sm:$0xff]  ;;  %s3288_s6 = sld [smem:[#allocation20_spill]] }
0x10c7   :  { %2473 = vpow2.f32 %v1900_v28  ;;  %2011 = vmatpush.msrb.mxu0 %v2312_v17 }
0x10c8   :  { %v1898_v33 = vmul.f32 1.442695, %v1896_v32 }
0x10ca   :  { %2475 = vpow2.f32 %v1898_v33 }
0x10cc   :  { %s2240_s7 = sshll.u32 %s3288_s6, 4  ;;  %s2241_s7 = int_to_ptr.hbm [resolvable:$true] %s2240_s7 }
0x10cd   :  { %v3176_v34 = vpop.eup %2473 }
0x10ce   :  { %v1905_v35 = vsel %vm236_vm1, %v3176_v34, 0.0 }
0x10cf   :  { %1906 = vadd.xlane.f32.xlu2 %v1905_v35 }
0x10d0   :  { %v2476_v36 = vpop.eup %2475 }
0x10d1   :  { %v1902_v37 = vsel %vm236_vm1, %v2476_v36, 0.0 }
0x10d2   :  { %1903 = vadd.xlane.f32.xlu0 %v1902_v37 }
0x10e6   :  { %2387 = vrot.lane.b32.xlu0 %v2386_v38, %s2686_s29 }
0x111a   :  { %v1718_v39 = vpop.xlane.xlu1 %1717 }
0x111b   :  { %2477 = vrcp.f32 %v1718_v39  ;;  %v1745_v45 = vand.u32 2147483648, %v1718_v39  ;;  %vm1739_vm15 = vweird.f32 %v1718_v39  ;;  %v1743_v63 = vand.u32 2147483647, %v1718_v39 }
0x111d   :  { %v1746_v49 = vor.u32 1.1754944e-38, %v1745_v45  ;;  %vm1744_vm3 = vcmp.eq.f32.partialorder %v1743_v63, 8.507059e+37 }
0x1121   :  { %v2478_v40 = vpop.eup %2477 }
0x1122   :  { %v1735_v41 = vmul.f32 %v2478_v40, %v1718_v39  ;;  %vm1740_vm14 = vweird.f32 %v2478_v40 }
0x1123   :  { %vm1741_vm2 = vmor %vm1739_vm15, %vm1740_vm14 }
0x1124   :  { %v1736_v42 = vsub.f32 1.0, %v1735_v41 }
0x1126   :  { %v1737_v43 = vmul.f32 %v2478_v40, %v1736_v42 }
0x1128   :  { %v1738_v44 = vadd.f32 %v2478_v40, %v1737_v43 }
0x112a   :  { %v1742_v48 = vsel %vm1741_vm2, %v2478_v40, %v1738_v44 }
0x112b   :  { %v1747_v50 = vsel %vm1744_vm3, %v1746_v49, %v1742_v48 }
0x112c   :  { %v1748_v58 = vmul.f32 %v2472_v23, %v1747_v50  ;;  %v1824_v23 = vpop.f32.mrf.mxu2 }
0x112d   :  { %v1830_v25 = vadd.f32 %v1824_v23, %v1638_v24  ;;  %v2352_v24 = vld [vmem:[%s3277_s12 + $0x50] sm:$0xff] }
0x1132   :  { %v1776_v51 = vpop.permute.xlu1 %1775 }
0x1133   :  { %1796 = vmatpush.msra.mxu1 %v1776_v51  ;;  %v2091_v51 = vld [vmem:[#allocation10 + $0x30] sm:$0xff] }
0x1134   :  { %2334 = vmatmul.msk.f32.vlgmr.msra.gmra.mxu1 %vm236_vm1, %v1748_v58  ;;  %v2090_v58 = vld [vmem:[#allocation10 + $0x28] sm:$0xff] }
0x1142   :  { %v1907_v0 = vpop.xlane.xlu2 %1906 }
0x1143   :  { %2479 = vrcp.f32 %v1907_v0  ;;  %v1934_v62 = vand.u32 2147483648, %v1907_v0  ;;  %vm1928_vm6 = vweird.f32 %v1907_v0  ;;  %v1932_v3 = vand.u32 2147483647, %v1907_v0 }
0x1145   :  { %v1904_v52 = vpop.xlane.xlu0 %1903  ;;  %v1935_v14 = vor.u32 1.1754944e-38, %v1934_v62  ;;  %vm1933_vm10 = vcmp.eq.f32.partialorder %v1932_v3, 8.507059e+37 }
0x1146   :  { %2481 = vrcp.f32 %v1904_v52  ;;  %v1919_v1 = vand.u32 2147483648, %v1904_v52  ;;  %v1917_v4 = vand.u32 2147483647, %v1904_v52  ;;  %vm1913_vm8 = vweird.f32 %v1904_v52 }
0x1148   :  { %v1920_v46 = vor.u32 1.1754944e-38, %v1919_v1  ;;  %vm1918_vm11 = vcmp.eq.f32.partialorder %v1917_v4, 8.507059e+37  ;;  %v2353_v1 = vld [vmem:[%s3277_s12 + $0x58] sm:$0xff] }
0x1149   :  { %v2480_v61 = vpop.eup %2479 }
0x114a   :  { %v1924_v53 = vmul.f32 %v2480_v61, %v1907_v0  ;;  %vm1929_vm4 = vweird.f32 %v2480_v61  ;;  %v2089_v0 = vld [vmem:[#allocation10 + $0x20] sm:$0xff] }
0x114b   :  { %vm1930_vm7 = vmor %vm1928_vm6, %vm1929_vm4 }
0x114c   :  { %v2482_v55 = vpop.eup %2481  ;;  %v1925_v56 = vsub.f32 1.0, %v1924_v53 }
0x114d   :  { %v1909_v57 = vmul.f32 %v2482_v55, %v1904_v52  ;;  %vm1914_vm5 = vweird.f32 %v2482_v55 }
0x114e   :  { %v1926_v27 = vmul.f32 %v2480_v61, %v1925_v56  ;;  %vm1915_vm9 = vmor %vm1913_vm8, %vm1914_vm5  ;;  %v2356_v56 = vld [vmem:[%s3277_s12 + $0x70] sm:$0xff] }
0x114f   :  { %v1910_v59 = vsub.f32 1.0, %v1909_v57  ;;  %v2355_v57 = vld [vmem:[%s3277_s12 + $0x68] sm:$0xff] }
0x1150   :  { %v1927_v60 = vadd.f32 %v2480_v61, %v1926_v27 }
0x1151   :  { %v1911_v29 = vmul.f32 %v2482_v55, %v1910_v59 }
0x1152   :  { %v1931_v19 = vsel %vm1930_vm7, %v2480_v61, %v1927_v60  ;;  %v2354_v60 = vld [vmem:[%s3277_s12 + $0x60] sm:$0xff] }
0x1153   :  { %v1912_v5 = vadd.f32 %v2482_v55, %v1911_v29  ;;  %v1936_v6 = vsel %vm1933_vm10, %v1935_v14, %v1931_v19 }
0x1154   :  { %v1937_v13 = vmul.f32 %v3176_v34, %v1936_v6  ;;  %v1641_v34 = vadd.f32 %v3169_v10, %v1611_v22  ;;  %v2403_v6 = vld [vmem:[#allocation8 + $0x1] ss:$0 sm:$0xff] }
0x1155   :  { %v1916_v16 = vsel %vm1915_vm9, %v2482_v55, %v1912_v5  ;;  %v2357_v55 = vld [vmem:[%s3277_s12 + $0x78] sm:$0xff] }
0x1156   :  { %v1921_v7 = vsel %vm1918_vm11, %v1920_v46, %v1916_v16  ;;  %2157 = vmatpush.msrb.mxu2 %v2357_v55 }
0x1157   :  { %v1922_v12 = vmul.f32 %v2476_v36, %v1921_v7 }
0x1158   :  { %v2388_v8 = vpop.permute.xlu0 %2387  ;;  %2158 = vmatpush.msrb.mxu2 %v2356_v56 }
0x1159   :  { %v2390_v9 = vunpack.i.h.bf16 %v2388_v8  ;;  %v2389_v11 = vunpack.i.l.bf16 %v2388_v8 }
0x115a   :  { %2159 = vmatpush.msrb.mxu2 %v2355_v57 }
0x115b   :  { %1959 = vmatpush.msrb.mxu1 %v2389_v11  ;;  %1985 = vmatpush.msra.mxu3 %v2390_v9  ;;  %v2404_v11 = vld [vmem:[%s3274_s9 + $0x1] ss:$0 sm:$0xff] }
0x115c   :  { %2341 = vmatmul.msk.f32.vlgmr.msrb.gmra.mxu1 %vm236_vm1, %v1922_v12  ;;  %2342 = vmatmul.msk.f32.vlgmr.msra.gmra.mxu3 %vm236_vm1, %v1937_v13 }
0x115d   :  { %2160 = vmatpush.msrb.mxu2 %v2354_v60 }
0x115f   :  { %2161 = vmatpush.msrb.mxu2 %v2353_v1 }
0x1161   :  { %2162 = vmatpush.msrb.mxu2 %v2352_v24 }
0x11b1   :  { %v1798_v15 = vpop.f32.mrf.mxu1 }
0x11b2   :  { %2336 = vmatmul.msk.f32.gmra.mxu2 %vm236_vm1, %v1798_v15 }
0x11d9   :  { %v1961_v18 = vpop.f32.mrf.mxu1 }
0x11da   :  { %2343 = vmatmul.msk.f32.vlgmr.msrb.gmra.mxu0 %vm236_vm1, %v1961_v18 }
0x11df   :  { %v1987_v20 = vpop.f32.mrf.mxu3 }
0x11e2   :  { %2344 = vmatmul.msk.f32.gmra.mxu0 %vm236_vm1, %v1987_v20 }
0x1235   :  { %v1827_v33 = vpop.f32.mrf.mxu2 }
0x1236   :  { %v1831_v36 = vadd.f32 %v1827_v33, %v1641_v34 }
0x1257   :  { %v2013_v28 = vpop.f32.mrf.mxu0 }
0x1258   :  { %v2019_v30 = vadd.f32 %v2013_v28, %v1830_v25  ;;  %v2351_v25 = vld [vmem:[%s3277_s12 + $0x48] sm:$0xff]  ;;  %v2405_v28 = vld [vmem:[%s3276_s11 + $0x1] ss:$0 sm:$0xff] }
0x1259   :  { %2163 = vmatpush.msrb.mxu2 %v2351_v25 }
0x125a   :  { %v2026_v32 = vadd.f32 %v2402_v26, %v2019_v30 }
0x125c   :  { %v2028_v35 = vadd.f32 %v2026_v32, %v3056_v47 }
0x125e   :  { %v2034_v37 = vsel %vm162_vm0, %v2028_v35, 0.0 }
0x125f   :  { %2035 = vadd.xlane.f32.xlu2 %v2034_v37  ;;  %v2016_v38 = vpop.f32.mrf.mxu0  ;;  %v2406_v37 = vld [vmem:[%s3278_s13 + $0x1] ss:$0 sm:$0xff]  ;;  %s2689_s13 = smov [#allocation13]  }
0x1260   :  { %v2020_v39 = vadd.f32 %v2016_v38, %v1831_v36  ;;  %s2238_s29 = sshll.u32 %s2689_s13, 4  ;;  %s2239_s29 = int_to_ptr.vmem [resolvable:$true] %s2238_s29 }
0x1262   :  { %v2027_v31 = vadd.f32 %v2402_v26, %v2020_v39  ;;  %v2350_v26 = vld [vmem:[%s3277_s12 + $0x40] sm:$0xff] }
0x1263   :  { %2164 = vmatpush.msrb.mxu2 %v2350_v26 }
0x1264   :  { %v2029_v40 = vadd.f32 %v2027_v31, %v3062_v54  ;;  %v2092_v54 = vld [vmem:[#allocation10 + $0x38] sm:$0xff] }
0x1265   :  { %2116 = vmatpush.msra.mxu1 %v2092_v54 }
0x1266   :  { %v2037_v41 = vsel %vm162_vm0, %v2029_v40, 0.0 }
0x1267   :  { %2038 = vadd.xlane.f32.xlu2 %v2037_v41  ;;  %2117 = vmatpush.msra.mxu1 %v2091_v51 }
0x1269   :  { %2118 = vmatpush.msra.mxu1 %v2090_v58 }
0x126b   :  { %2119 = vmatpush.msra.mxu1 %v2089_v0 }
0x12d2   :  { %v2036_v42 = vpop.xlane.xlu2 %2035 }
0x12d3   :  { %v2040_v43 = vmul.f32 %v2036_v42, %v2976_v2 }
0x12d5   :  { %v2042_v44 = vsub.f32 %v2028_v35, %v2040_v43 }
0x12d7   :  { %v2044_v45 = vmul.f32 %v2042_v44, %v2042_v44 }
0x12d9   :  { %v2046_v10 = vsel %vm162_vm0, %v2044_v45, 0.0 }
0x12da   :  { %2047 = vadd.xlane.f32.xlu2 %v2046_v10  ;;  %v2039_v47 = vpop.xlane.xlu2 %2038 }
0x12db   :  { %v2041_v63 = vmul.f32 %v2039_v47, %v2976_v2 }
0x12dd   :  { %v2043_v48 = vsub.f32 %v2029_v40, %v2041_v63 }
0x12df   :  { %v2045_v49 = vmul.f32 %v2043_v48, %v2043_v48 }
0x12e1   :  { %v2049_v50 = vsel %vm162_vm0, %v2045_v49, 0.0 }
0x12e2   :  { %2050 = vadd.xlane.f32.xlu0 %v2049_v50 }
0x134d   :  { %v2048_v52 = vpop.xlane.xlu2 %2047 }
0x134e   :  { %v2052_v61 = vmul.f32 %v2048_v52, %v2976_v2 }
0x1350   :  { %v2054_v53 = vadd.f32 1e-05, %v2052_v61 }
0x1352   :  { %2483 = vrsqrt.f32 %v2054_v53  ;;  %vm2062_vm12 = vweird.f32 %v2054_v53 }
0x1355   :  { %v2051_v27 = vpop.xlane.xlu0 %2050 }
0x1356   :  { %v2053_v59 = vmul.f32 %v2051_v27, %v2976_v2 }
0x1358   :  { %v2484_v62 = vpop.eup %2483  ;;  %v2055_v29 = vadd.f32 1e-05, %v2053_v59 }
0x1359   :  { %v2057_v3 = vmul.f32 %v2484_v62, %v2054_v53  ;;  %vm2063_vm1 = vweird.f32 %v2484_v62 }
0x135a   :  { %2485 = vrsqrt.f32 %v2055_v29  ;;  %vm2064_vm14 = vmor %vm2062_vm12, %vm2063_vm1  ;;  %vm2072_vm2 = vweird.f32 %v2055_v29 }
0x135b   :  { %v2058_v4 = vmul.f32 %v2484_v62, %v2057_v3 }
0x135d   :  { %v2059_v5 = vmul.f32 0.5, %v2058_v4  ;;  %v2407_v4 = vld [vmem:[#allocation11 + $0x1] ss:$0 sm:$0xff] }
0x135f   :  { %v2060_v19 = vsub.f32 1.5, %v2059_v5 }
0x1360   :  { %v2486_v14 = vpop.eup %2485 }
0x1361   :  { %v2061_v16 = vmul.f32 %v2484_v62, %v2060_v19  ;;  %v2067_v46 = vmul.f32 %v2486_v14, %v2055_v29  ;;  %vm2073_vm15 = vweird.f32 %v2486_v14 }
0x1362   :  { %vm2074_vm3 = vmor %vm2072_vm2, %vm2073_vm15 }
0x1363   :  { %v2065_v7 = vsel %vm2064_vm14, %v2484_v62, %v2061_v16  ;;  %v2068_v8 = vmul.f32 %v2486_v14, %v2067_v46 }
0x1364   :  { %v2076_v9 = vmul.f32 %v2065_v7, %v2042_v44 }
0x1365   :  { %v2069_v12 = vmul.f32 0.5, %v2068_v8 }
0x1366   :  { %v2081_v13 = vmul.f32 %v2403_v6, %v2076_v9 }
0x1367   :  { %v2070_v15 = vsub.f32 1.5, %v2069_v12 }
0x1368   :  { %v2086_v17 = vadd.f32 %v2404_v11, %v2081_v13 }
0x1369   :  { %v2071_v18 = vmul.f32 %v2486_v14, %v2070_v15 }
0x136a   :  { %2348 = vmatmul.msk.f32.vlgmr.msra.gmra.mxu1 %vm162_vm0, %v2086_v17 }
0x136b   :  { %v2075_v20 = vsel %vm2074_vm3, %v2486_v14, %v2071_v18 }
0x136c   :  { %v2077_v21 = vmul.f32 %v2075_v20, %v2043_v48 }
0x136e   :  { %v2082_v22 = vmul.f32 %v2403_v6, %v2077_v21 }
0x1370   :  { %v2087_v23 = vadd.f32 %v2404_v11, %v2082_v22 }
0x1372   :  { %2349 = vmatmul.msk.f32.gmra.mxu1 %vm162_vm0, %v2087_v23 }
0x13e7   :  { %v2121_v30 = vpop.f32.mrf.mxu1 }
0x13e8   :  { %v2122_v32 = vadd.f32 %v2405_v28, %v2121_v30 }
0x13ea   :  { %v2127_v33 = vmax.f32 %v2122_v32, 0.0 }
0x13ec   :  { %2359 = vmatmul.msk.f32.vlgmr.msrb.gmra.mxu2 %vm1102_vm13, %v2127_v33 }
0x13ef   :  { %v2124_v34 = vpop.f32.mrf.mxu1 }
0x13f0   :  { %v2125_v35 = vadd.f32 %v2405_v28, %v2124_v34 }
0x13f2   :  { %v2128_v36 = vmax.f32 %v2125_v35, 0.0 }
0x13f4   :  { %2360 = vmatmul.msk.f32.gmra.mxu2 %vm1102_vm13, %v2128_v36 }
0x146f   :  { %v2166_v38 = vpop.f32.mrf.mxu2 }
0x1470   :  { %v2167_v39 = vadd.f32 %v2406_v37, %v2166_v38 }
0x1472   :  { %v2172_v31 = vadd.f32 %v2167_v39, %v2086_v17 }
0x1474   :  { %v2178_v40 = vsel %vm162_vm0, %v2172_v31, 0.0 }
0x1475   :  { %2179 = vadd.xlane.f32.xlu1 %v2178_v40 }
0x1477   :  { %v2169_v41 = vpop.f32.mrf.mxu2 }
0x1478   :  { %v2170_v42 = vadd.f32 %v2406_v37, %v2169_v41 }
0x147a   :  { %v2173_v43 = vadd.f32 %v2170_v42, %v2087_v23 }
0x147c   :  { %v2181_v44 = vsel %vm162_vm0, %v2173_v43, 0.0 }
0x147d   :  { %2182 = vadd.xlane.f32.xlu2 %v2181_v44 }
0x14e8   :  { %v2180_v45 = vpop.xlane.xlu1 %2179 }
0x14e9   :  { %v2184_v10 = vmul.f32 %v2180_v45, %v2976_v2 }
0x14eb   :  { %v2186_v47 = vsub.f32 %v2172_v31, %v2184_v10 }
0x14ed   :  { %v2188_v63 = vmul.f32 %v2186_v47, %v2186_v47 }
0x14ef   :  { %v2190_v48 = vsel %vm162_vm0, %v2188_v63, 0.0 }
0x14f0   :  { %v2183_v49 = vpop.xlane.xlu2 %2182  ;;  %2191 = vadd.xlane.f32.xlu2 %v2190_v48 }
0x14f1   :  { %v2185_v50 = vmul.f32 %v2183_v49, %v2976_v2 }
0x14f3   :  { %v2187_v54 = vsub.f32 %v2173_v43, %v2185_v50 }
0x14f5   :  { %v2189_v51 = vmul.f32 %v2187_v54, %v2187_v54 }
0x14f7   :  { %v2193_v58 = vsel %vm162_vm0, %v2189_v51, 0.0 }
0x14f8   :  { %2194 = vadd.xlane.f32.xlu2 %v2193_v58 }
0x1563   :  { %v2192_v0 = vpop.xlane.xlu2 %2191 }
0x1564   :  { %v2196_v52 = vmul.f32 %v2192_v0, %v2976_v2 }
0x1566   :  { %v2198_v61 = vadd.f32 1e-05, %v2196_v52 }
0x1568   :  { %2487 = vrsqrt.f32 %v2198_v61  ;;  %vm2206_vm4 = vweird.f32 %v2198_v61 }
0x156b   :  { %v2195_v53 = vpop.xlane.xlu2 %2194 }
0x156c   :  { %v2197_v55 = vmul.f32 %v2195_v53, %v2976_v2  ;;  %v2408_v2 = vld [vmem:[%s3280_s15 + $0x1] ss:$0 sm:$0xff] }
0x156e   :  { %v2488_v56 = vpop.eup %2487  ;;  %v2199_v57 = vadd.f32 1e-05, %v2197_v55 }
0x156f   :  { %v2201_v27 = vmul.f32 %v2488_v56, %v2198_v61  ;;  %vm2207_vm13 = vweird.f32 %v2488_v56 }
0x1570   :  { %2489 = vrsqrt.f32 %v2199_v57  ;;  %vm2208_vm5 = vmor %vm2206_vm4, %vm2207_vm13  ;;  %vm2216_vm7 = vweird.f32 %v2199_v57 }
0x1571   :  { %v2202_v59 = vmul.f32 %v2488_v56, %v2201_v27 }
0x1573   :  { %v2203_v60 = vmul.f32 0.5, %v2202_v59 }
0x1575   :  { %v2204_v62 = vsub.f32 1.5, %v2203_v60 }
0x1576   :  { %v2490_v29 = vpop.eup %2489 }
0x1577   :  { %v2205_v1 = vmul.f32 %v2488_v56, %v2204_v62  ;;  %v2211_v3 = vmul.f32 %v2490_v29, %v2199_v57  ;;  %vm2217_vm6 = vweird.f32 %v2490_v29 }
0x1578   :  { %vm2218_vm8 = vmor %vm2216_vm7, %vm2217_vm6 }
0x1579   :  { %v2209_v5 = vsel %vm2208_vm5, %v2488_v56, %v2205_v1  ;;  %v2212_v19 = vmul.f32 %v2490_v29, %v2211_v3 }
0x157a   :  { %v2220_v14 = vmul.f32 %v2209_v5, %v2186_v47 }
0x157b   :  { %v2213_v16 = vmul.f32 0.5, %v2212_v19 }
0x157c   :  { %v2225_v46 = vmul.f32 %v2407_v4, %v2220_v14 }
0x157d   :  { %v2214_v6 = vsub.f32 1.5, %v2213_v16 }
0x157e   :  { %v2230_v7 = vadd.f32 %v2408_v2, %v2225_v46 }
0x157f   :  { %v2215_v8 = vmul.f32 %v2490_v29, %v2214_v6 }
0x1580   :  { %2232 = vst.msk [vmem:[#allocation13] sm:$0xff] %vm162_vm0, %v2230_v7 }
0x1581   :  { %v2219_v9 = vsel %vm2218_vm8, %v2490_v29, %v2215_v8 }
0x1582   :  { %v2221_v11 = vmul.f32 %v2219_v9, %v2187_v54 }
0x1584   :  { %v2226_v12 = vmul.f32 %v2407_v4, %v2221_v11 }
0x1586   :  { %v2231_v13 = vadd.f32 %v2408_v2, %v2226_v12 }
0x1588   :  { %2233 = vst.msk [vmem:[#allocation13 + $0x8] sm:$0xff] %vm162_vm0, %v2231_v13 }
0x1589   :  { %2246 = dma.vmem_to_hbm [thread:$0]  %s2239_s29, 256, %s2241_s7, [#allocation4], %s3287_s8, %s3287_s8, %s2673_s27  }
0x158a   :  { %2669 = dma.done.wait [#allocation4], 256  }
0x158b   :  { %2670 = vsyncadd [#allocation4], 4294967040 }
0x158c   :  { %2251 = vsyncpa [#allocation3], 1 }
0x158d   :  { %2252 = vsyncpa [#allocation6], 1 }
0x158e   :  { %2253 = vsyncpa [#allocation9], 1 }
0x158f   :  { %2254 = vsyncpa [#allocation12], 1 }
0x1590   :  { %2255 = vsyncpa [#allocation4], 1 }

</bundles_post_ra>
